<compile_context>
chip_gen: v7x
topology: tpu7x:2x2x1
jax: 0.10.0
libtpu: 0.0.40
codegen_flags: <defaults>
</compile_context>

<pallas_src>
import functools
import math

import jax
import jax.numpy as jnp
from jax import lax
from jax.experimental import pallas as pl
from jax.experimental.pallas import tpu as pltpu


# ---------------------------------------------------------------------------
# small helpers
# ---------------------------------------------------------------------------
def _layernorm(x, g, b, eps=1e-5):
    """LayerNorm over the last axis, f32 math (PyTorch eps=1e-5)."""
    mu = jnp.mean(x, axis=-1, keepdims=True)
    xc = x - mu
    var = jnp.mean(xc * xc, axis=-1, keepdims=True)
    return xc * lax.rsqrt(var + eps) * g + b


def _round_up(a, b):
    return ((a + b - 1) // b) * b


def _pick_tile(dim, cap, align):
    """Largest `align`-multiple divisor of `dim` that is <= cap (fallback: dim)."""
    cap = min(cap, dim)
    best = 0
    t = align
    while t <= cap:
        if dim % t == 0:
            best = t
        t += align
    return best if best else dim


# ---------------------------------------------------------------------------
# Kernel 1: input_fc  (M-parallel, K-reduction with f32 accumulator scratch)
# ---------------------------------------------------------------------------
def _input_fc_kernel(x_ref, w_ref, b_ref, o_ref, acc_ref):
    k = pl.program_id(1)

    @pl.when(k == 0)
    def _():
        acc_ref[...] = jnp.zeros_like(acc_ref)

    acc_ref[...] += jnp.dot(x_ref[...], w_ref[...],
                            preferred_element_type=jnp.float32)

    @pl.when(k == pl.num_programs(1) - 1)
    def _():
        o_ref[...] = acc_ref[...] + b_ref[...]


def input_fc(x, w, b, *, tk=None):
    """y = x @ w + b.  x:[M,K] bf16, w:[K,N] bf16, b:[1,N] f32 -> [M,N] f32."""
    M, K = x.shape
    N = w.shape[1]
    tm = _pick_tile(M, 256, 8)                       # falls back to full M
    if tk is None:
        # largest 128-aligned K tile whose 2x double-buffered bf16 x/w tiles
        # (+ f32 accumulator) fit a conservative per-generation VMEM budget.
        budget = 8 * 1024 * 1024
        tk = max(128, (budget // (4 * (tm + N))) // 128 * 128)
    tk = min(tk, _round_up(K, 128))
    Kp = _round_up(K, tk)
    if Kp != K:                                       # zero rows/cols add nothing
        x = jnp.pad(x, ((0, 0), (0, Kp - K)))
        w = jnp.pad(w, ((0, Kp - K), (0, 0)))
    grid = (M // tm, Kp // tk)
    return pl.pallas_call(
        _input_fc_kernel,
        out_shape=jax.ShapeDtypeStruct((M, N), jnp.float32),
        grid=grid,
        in_specs=[
            pl.BlockSpec((tm, tk), lambda i, k: (i, k)),
            pl.BlockSpec((tk, N), lambda i, k: (k, 0)),
            pl.BlockSpec((1, N), lambda i, k: (0, 0)),
        ],
        out_specs=pl.BlockSpec((tm, N), lambda i, k: (i, 0)),
        scratch_shapes=[pltpu.VMEM((tm, N), jnp.float32)],
        compiler_params=pltpu.CompilerParams(
            dimension_semantics=("parallel", "arbitrary"),
            vmem_limit_bytes=48 * 1024 * 1024),
    )(x, w, b)


# ---------------------------------------------------------------------------
# Kernel 2: encoder stack (+ fused output head), grid = (batch, layer)
# ---------------------------------------------------------------------------
def _encoder_stack_kernel(x_ref, wqkv_ref, wo_ref, w1_ref, w2_ref, vecs_ref,
                          hw1_ref, hb1_ref, hw2_ref, hb2_ref,
                          head_ref, resid_ref, *, L, D, nhead, dh, dff):
    l = pl.program_id(1)
    bf = jnp.bfloat16

    # Residual for this batch element stays VMEM-resident across the layer axis.
    @pl.when(l == 0)
    def _():
        resid_ref[...] = x_ref[...]

    t = resid_ref[...]                                  # [L, D] f32

    vecs = vecs_ref[0]                                  # [8, W] packed per-layer vectors
    bqkv = vecs[0:1, :3 * D]
    bo = vecs[1:2, :D]
    ln1g = vecs[2:3, :D]
    ln1b = vecs[3:4, :D]
    b1 = vecs[4:5, :dff]
    b2 = vecs[5:6, :D]
    ln2g = vecs[6:7, :D]
    ln2b = vecs[7:8, :D]

    # ---- multi-head self-attention (fused QKV, per-head softmax, out-proj) ----
    qkv = jnp.dot(t.astype(bf), wqkv_ref[0],
                  preferred_element_type=jnp.float32) + bqkv       # [L, 3D]
    # D is a multiple of 128 -> lane-aligned Q/K/V splits.
    q = qkv[:, :D]
    k = qkv[:, D:2 * D]
    v = qkv[:, 2 * D:3 * D]

    scale = 1.0 / math.sqrt(dh)
    ctx_heads = []
    for h in range(nhead):                               # unroll is only nhead wide
        c0 = h * dh
        qh = q[:, c0:c0 + dh].astype(bf)
        kh = k[:, c0:c0 + dh].astype(bf)
        vh = v[:, c0:c0 + dh].astype(bf)
        s = lax.dot_general(qh, kh, (((1,), (1,)), ((), ())),
                            preferred_element_type=jnp.float32) * scale   # [L, L]
        m = jnp.max(s, axis=-1, keepdims=True)
        p = jnp.exp(s - m)
        p = p * pl.reciprocal(jnp.sum(p, axis=-1, keepdims=True), approx=True)
        ctx_heads.append(jnp.dot(p.astype(bf), vh,
                                 preferred_element_type=jnp.float32))
    # one lane-dense [L, D] value: no masked sub-128-lane stores, no ctx scratch
    ctx = jnp.concatenate(ctx_heads, axis=-1)

    attn = jnp.dot(ctx.astype(bf), wo_ref[0],
                   preferred_element_type=jnp.float32) + bo
    t = _layernorm(t + attn, ln1g, ln1b)                 # norm1(x + self_attn(x))

    # ---- feed-forward (w1 / ReLU / w2 fused) ----------------------------------
    h1 = jnp.maximum(jnp.dot(t.astype(bf), w1_ref[0],
                             preferred_element_type=jnp.float32) + b1, 0.0)
    ff = jnp.dot(h1.astype(bf), w2_ref[0],
                 preferred_element_type=jnp.float32) + b2
    t = _layernorm(t + ff, ln2g, ln2b)                   # norm2(x + ff(x))

    resid_ref[...] = t

    # ---- fused output head on the final layer step ----------------------------
    @pl.when(l == pl.num_programs(1) - 1)
    def _():
        # last token, sublane-broadcast to a full 8-row tile so the head matmuls
        # and the final store are dense (no masked partial stores).
        x_last = jnp.broadcast_to(t[L - 1:L, :], (8, D))
        hh = jnp.maximum(
            jnp.dot(x_last.astype(bf), hw1_ref[...],
                    preferred_element_type=jnp.float32) + hb1_ref[...], 0.0)
        y = jnp.dot(hh.astype(bf), hw2_ref[...],
                    preferred_element_type=jnp.float32) + hb2_ref[...]   # [8, 1]
        head_ref[0] = jnp.broadcast_to(y, (8, 128))                      # lane-dense


def encoder_stack_with_head(t, params, *, B, L, nhead):
    M, D = t.shape
    assert M == B * L
    assert L % 8 == 0, "pad seq_len to a multiple of 8"   # TODO(synk): L=12 -> pad to 16
    enc = params["enc"]
    NL = enc["wqkv"].shape[0]
    dff = enc["w1"].shape[2]
    Wvec = enc["vecs"].shape[2]
    HH = params["out_w1"].shape[1]
    dh = D // nhead
    kern = functools.partial(_encoder_stack_kernel, L=L, D=D, nhead=nhead,
                             dh=dh, dff=dff)

    def lspec(shape):                                   # per-layer stacked weights
        return pl.BlockSpec((1,) + shape, lambda b, l: (l, 0, 0))

    # grid = (batch, layer): batch "parallel" (v7x megacore sharding), layer
    # "arbitrary" (residual carried in scratch).  Head weights use a constant
    # block index -> DMA'd once and kept resident.
    return pl.pallas_call(
        kern,
        out_shape=jax.ShapeDtypeStruct((B, 8, 128), jnp.float32),
        grid=(B, NL),
        in_specs=[
            pl.BlockSpec((L, D), lambda b, l: (b, 0)),        # residual init
            lspec((D, 3 * D)),                                # wqkv
            lspec((D, D)),                                    # wo
            lspec((D, dff)),                                  # w1
            lspec((dff, D)),                                  # w2
            lspec((8, Wvec)),                                 # packed bias/LN vectors
            pl.BlockSpec((D, HH), lambda b, l: (0, 0)),       # head w1
            pl.BlockSpec((1, HH), lambda b, l: (0, 0)),       # head b1
            pl.BlockSpec((HH, 1), lambda b, l: (0, 0)),       # head w2
            pl.BlockSpec((1, 1), lambda b, l: (0, 0)),        # head b2
        ],
        out_specs=pl.BlockSpec((1, 8, 128), lambda b, l: (b, 0, 0)),
        scratch_shapes=[pltpu.VMEM((L, D), jnp.float32)],     # resident residual
        compiler_params=pltpu.CompilerParams(
            dimension_semantics=("parallel", "arbitrary"),
            vmem_limit_bytes=48 * 1024 * 1024),
    )(t, enc["wqkv"], enc["wo"], enc["w1"], enc["w2"], enc["vecs"],
      params["out_w1"], params["out_b1"], params["out_w2"], params["out_b2"])


# ---------------------------------------------------------------------------
# Parameters (deterministic synthetic init; matmul weights stored bf16)
# ---------------------------------------------------------------------------
def init_params(key, input_size, d_model, nhead, num_layers, d_ff, d_head_hidden):
    D, NL = d_model, num_layers
    Wvec = max(3 * D, d_ff)

    def dense(k, fi, fo):
        return (0.02 * jax.random.normal(k, (fi, fo), jnp.float32)).astype(jnp.bfloat16)

    keys = jax.random.split(key, 4 + NL)
    params = {
        "input_fc_w": dense(keys[0], input_size, D),
        "input_fc_b": 0.01 * jax.random.normal(keys[1], (1, D), jnp.float32),
        "out_w1": dense(keys[2], D, d_head_hidden),
        "out_b1": jnp.zeros((1, d_head_hidden), jnp.float32),
        "out_w2": dense(keys[3], d_head_hidden, 1),
        "out_b2": jnp.zeros((1, 1), jnp.float32),
    }
    wqkv, wo, w1, w2, vecs = [], [], [], [], []
    for i in range(NL):
        lk = jax.random.split(keys[4 + i], 8)
        wqkv.append(dense(lk[0], D, 3 * D))
        wo.append(dense(lk[1], D, D))
        w1.append(dense(lk[2], D, d_ff))
        w2.append(dense(lk[3], d_ff, D))
        # 8 small per-layer vectors packed into one [8, Wvec] block:
        # 0:bqkv 1:bo 2:ln1_g 3:ln1_b 4:b1 5:b2 6:ln2_g 7:ln2_b
        vec = jnp.zeros((8, Wvec), jnp.float32)
        vec = vec.at[0, :3 * D].set(0.01 * jax.random.normal(lk[4], (3 * D,)))
        vec = vec.at[1, :D].set(0.01 * jax.random.normal(lk[5], (D,)))
        vec = vec.at[2, :D].set(jnp.ones((D,), jnp.float32))
        vec = vec.at[4, :d_ff].set(0.01 * jax.random.normal(lk[6], (d_ff,)))
        vec = vec.at[5, :D].set(0.01 * jax.random.normal(lk[7], (D,)))
        vec = vec.at[6, :D].set(jnp.ones((D,), jnp.float32))
        vecs.append(vec)
    params["enc"] = {
        "wqkv": jnp.stack(wqkv), "wo": jnp.stack(wo),
        "w1": jnp.stack(w1), "w2": jnp.stack(w2), "vecs": jnp.stack(vecs),
    }
    return params


# ---------------------------------------------------------------------------
# Forward pass (post-norm nn.TransformerEncoderLayer semantics), 2 pallas_calls
# ---------------------------------------------------------------------------
def sea_ice_transformer(x, params, *, nhead, fc_k_tile=None):
    B, L, C, H, W = x.shape
    M = B * L
    # bf16 activation stream into input_fc (ideally the data pipeline provides bf16).
    t = x.reshape(M, C * H * W).astype(jnp.bfloat16)
    t = input_fc(t, params["input_fc_w"], params["input_fc_b"], tk=fc_k_tile)
    out_pad = encoder_stack_with_head(t, params, B=B, L=L, nhead=nhead)
    return out_pad[:, 0, :1]                             # [B, 1]


# ---------------------------------------------------------------------------
# Pure-JAX reference (f32 math, same bf16-stored weights) for a loose check
# ---------------------------------------------------------------------------
def reference_forward(x, params, nhead):
    B, L = x.shape[0], x.shape[1]
    D = params["input_fc_w"].shape[1]
    dh = D // nhead
    enc = params["enc"]
    NL = enc["wqkv"].shape[0]
    dff = enc["w1"].shape[2]
    f32 = jnp.float32

    t = x.reshape(B, L, -1).astype(jnp.bfloat16).astype(f32)
    t = t @ params["input_fc_w"].astype(f32) + params["input_fc_b"][0]
    for i in range(NL):
        vec = enc["vecs"][i]
        qkv = t @ enc["wqkv"][i].astype(f32) + vec[0, :3 * D]
        q, k, v = qkv[..., :D], qkv[..., D:2 * D], qkv[..., 2 * D:]
        q = q.reshape(B, L, nhead, dh).transpose(0, 2, 1, 3)
        k = k.reshape(B, L, nhead, dh).transpose(0, 2, 1, 3)
        v = v.reshape(B, L, nhead, dh).transpose(0, 2, 1, 3)
        s = jnp.einsum("bhqd,bhkd->bhqk", q, k) / math.sqrt(dh)
        p = jax.nn.softmax(s, axis=-1)
        ctx = jnp.einsum("bhqk,bhkd->bhqd", p, v).transpose(0, 2, 1, 3).reshape(B, L, D)
        attn = ctx @ enc["wo"][i].astype(f32) + vec[1, :D]
        t = _layernorm(t + attn, vec[2, :D], vec[3, :D])
        h1 = jax.nn.relu(t @ enc["w1"][i].astype(f32) + vec[4, :dff])
        ff = h1 @ enc["w2"][i].astype(f32) + vec[5, :D]
        t = _layernorm(t + ff, vec[6, :D], vec[7, :D])
    last = t[:, -1, :]
    h = jax.nn.relu(last @ params["out_w1"].astype(f32) + params["out_b1"][0])
    return h @ params["out_w2"].astype(f32) + params["out_b2"][0]


# ---------------------------------------------------------------------------
if __name__ == "__main__":
    # Small, module-consistent shapes (real: C=10,H=428,W=300,L=12,D=512,nh=8,NL=4).
    B, L = 2, 8
    C, H, W = 4, 16, 16                # input_size = 1024
    d_model, nhead, num_layers = 128, 4, 2
    d_ff, d_head_hidden = 256, 256

    key = jax.random.PRNGKey(0)
    kx, kp = jax.random.split(key)
    x = jax.random.normal(kx, (B, L, C, H, W), dtype=jnp.float32)
    params = init_params(kp, C * H * W, d_model, nhead, num_layers, d_ff,
                         d_head_hidden)

    # fc_k_tile=256 exercises the K-reduction path of the input_fc kernel.
    fwd = jax.jit(functools.partial(sea_ice_transformer, nhead=nhead, fc_k_tile=256))
    out = fwd(x, params)
    jax.block_until_ready(out)

    ref = reference_forward(x, params, nhead)
    assert out.shape == (B, 1), out.shape
    assert bool(jnp.all(jnp.isfinite(out)))
    assert bool(jnp.allclose(out, ref, atol=5e-2, rtol=5e-2)), (out, ref)
    print("KERNEL_OK")
</pallas_src>

<mosaic_0001>
module attributes {stable_mosaic.version = 11 : i64} {
  func.func @_input_fc_kernel(%arg0: i32, %arg1: i32, %arg2: memref<16x256xbf16, #tpu.memory_space<vmem>>, %arg3: memref<256x128xbf16, #tpu.memory_space<vmem>>, %arg4: memref<1x128xf32, #tpu.memory_space<vmem>>, %arg5: memref<16x128xf32, #tpu.memory_space<vmem>>, %arg6: memref<16x128xf32, #tpu.memory_space<vmem>>) attributes {dimension_semantics = [#tpu.dimension_semantics<parallel>, #tpu.dimension_semantics<arbitrary>], iteration_bounds = array<i64: 1, 4>, scalar_prefetch = 0 : i64, scratch_operands = 1 : i64, tpu.core_type = #tpu.core_type<tc>, window_params = [{transform_indices = @transform_0, window_bounds = array<i64: 16, 256>}, {transform_indices = @transform_1, window_bounds = array<i64: 256, 128>}, {pipeline_mode = #tpu.pipeline_mode<synchronous>, transform_indices = @transform_2, window_bounds = array<i64: 1, 128>}, {transform_indices = @transform_3, window_bounds = array<i64: 16, 128>}]} {
    %c0_i32 = arith.constant 0 : i32
    %0 = arith.cmpi eq, %arg1, %c0_i32 : i32
    %1 = arith.extui %0 : i1 to i32
    %c0_i32_0 = arith.constant 0 : i32
    %2 = arith.cmpi ne, %1, %c0_i32_0 : i32
    scf.if %2 {
      %cst_9 = arith.constant 0.000000e+00 : f32
      %12 = vector.broadcast %cst_9 : f32 to vector<16x128xf32>
      %c0_10 = arith.constant 0 : index
      %c0_11 = arith.constant 0 : index
      %13 = vector.load %arg6[%c0_10, %c0_11] : memref<16x128xf32, #tpu.memory_space<vmem>>, vector<16x128xf32>
      tpu.vector_store %arg6[%c0_10, %c0_11], %12 {strides = array<i32>} : memref<16x128xf32, #tpu.memory_space<vmem>>, vector<16x128xf32>,
    } else {
    }
    %c0 = arith.constant 0 : index
    %c0_1 = arith.constant 0 : index
    %3 = vector.load %arg6[%c0, %c0_1] : memref<16x128xf32, #tpu.memory_space<vmem>>, vector<16x128xf32>
    %c0_2 = arith.constant 0 : index
    %c0_3 = arith.constant 0 : index
    %4 = vector.load %arg2[%c0_2, %c0_3] : memref<16x256xbf16, #tpu.memory_space<vmem>>, vector<16x256xbf16>
    %c0_4 = arith.constant 0 : index
    %c0_5 = arith.constant 0 : index
    %5 = vector.load %arg3[%c0_4, %c0_5] : memref<256x128xbf16, #tpu.memory_space<vmem>>, vector<256x128xbf16>
    %cst = arith.constant dense<0.000000e+00> : vector<16x128xf32>
    %6 = tpu.matmul %4, %5, %cst {dimension_numbers = #tpu.dot_dimension_numbers<[1], [0], [0], [1], [0, 0, 1, 1], [], []>} : vector<16x256xbf16>, vector<256x128xbf16>, vector<16x128xf32> -> vector<16x128xf32>
    %7 = arith.addf %3, %6 : vector<16x128xf32>
    %c0_6 = arith.constant 0 : index
    %c0_7 = arith.constant 0 : index
    %8 = vector.load %arg6[%c0_6, %c0_7] : memref<16x128xf32, #tpu.memory_space<vmem>>, vector<16x128xf32>
    tpu.vector_store %arg6[%c0_6, %c0_7], %7 {strides = array<i32>} : memref<16x128xf32, #tpu.memory_space<vmem>>, vector<16x128xf32>,
    %c3_i32 = arith.constant 3 : i32
    %9 = arith.cmpi eq, %arg1, %c3_i32 : i32
    %10 = arith.extui %9 : i1 to i32
    %c0_i32_8 = arith.constant 0 : i32
    %11 = arith.cmpi ne, %10, %c0_i32_8 : i32
    scf.if %11 {
      %c0_9 = arith.constant 0 : index
      %c0_10 = arith.constant 0 : index
      %12 = vector.load %arg6[%c0_9, %c0_10] : memref<16x128xf32, #tpu.memory_space<vmem>>, vector<16x128xf32>
      %c0_11 = arith.constant 0 : index
      %c0_12 = arith.constant 0 : index
      %13 = vector.load %arg4[%c0_11, %c0_12] : memref<1x128xf32, #tpu.memory_space<vmem>>, vector<1x128xf32>
      %14 = vector.broadcast %13 : vector<1x128xf32> to vector<16x128xf32>
      %15 = arith.addf %12, %14 : vector<16x128xf32>
      %c0_13 = arith.constant 0 : index
      %c0_14 = arith.constant 0 : index
      %16 = vector.load %arg5[%c0_13, %c0_14] : memref<16x128xf32, #tpu.memory_space<vmem>>, vector<16x128xf32>
      tpu.vector_store %arg5[%c0_13, %c0_14], %15 {strides = array<i32>} : memref<16x128xf32, #tpu.memory_space<vmem>>, vector<16x128xf32>,
    } else {
    }
    return
  }
  func.func @transform_0(%arg0: i32, %arg1: i32) -> (i32, i32) {
    %c0_i32 = arith.constant 0 : i32
    return %arg0, %arg1 : i32, i32
  }
  func.func @transform_1(%arg0: i32, %arg1: i32) -> (i32, i32) {
    %c0_i32 = arith.constant 0 : i32
    %c0_i32_0 = arith.constant 0 : i32
    return %arg1, %c0_i32 : i32, i32
  }
  func.func @transform_2(%arg0: i32, %arg1: i32) -> (i32, i32) {
    %c0_i32 = arith.constant 0 : i32
    %c0_i32_0 = arith.constant 0 : i32
    %c0_i32_1 = arith.constant 0 : i32
    return %c0_i32, %c0_i32_0 : i32, i32
  }
  func.func @transform_3(%arg0: i32, %arg1: i32) -> (i32, i32) {
    %c0_i32 = arith.constant 0 : i32
    %c0_i32_0 = arith.constant 0 : i32
    return %arg0, %c0_i32 : i32, i32
  }
}

module attributes {stable_mosaic.version = 11 : i64} {
  func.func @_encoder_stack_kernel(%arg0: i32, %arg1: i32, %arg2: memref<8x128xf32, #tpu.memory_space<vmem>>, %arg3: memref<1x128x384xbf16, #tpu.memory_space<vmem>>, %arg4: memref<1x128x128xbf16, #tpu.memory_space<vmem>>, %arg5: memref<1x128x256xbf16, #tpu.memory_space<vmem>>, %arg6: memref<1x256x128xbf16, #tpu.memory_space<vmem>>, %arg7: memref<1x8x384xf32, #tpu.memory_space<vmem>>, %arg8: memref<128x256xbf16, #tpu.memory_space<vmem>>, %arg9: memref<1x256xf32, #tpu.memory_space<vmem>>, %arg10: memref<256x1xbf16, #tpu.memory_space<vmem>>, %arg11: memref<1x1xf32, #tpu.memory_space<vmem>>, %arg12: memref<1x8x128xf32, #tpu.memory_space<vmem>>, %arg13: memref<8x128xf32, #tpu.memory_space<vmem>>) attributes {dimension_semantics = [#tpu.dimension_semantics<parallel>, #tpu.dimension_semantics<arbitrary>], iteration_bounds = array<i64: 2, 2>, scalar_prefetch = 0 : i64, scratch_operands = 1 : i64, tpu.core_type = #tpu.core_type<tc>, window_params = [{transform_indices = @transform_0, window_bounds = array<i64: 8, 128>}, {transform_indices = @transform_1, window_bounds = array<i64: 1, 128, 384>}, {transform_indices = @transform_2, window_bounds = array<i64: 1, 128, 128>}, {transform_indices = @transform_3, window_bounds = array<i64: 1, 128, 256>}, {transform_indices = @transform_4, window_bounds = array<i64: 1, 256, 128>}, {transform_indices = @transform_5, window_bounds = array<i64: 1, 8, 384>}, {pipeline_mode = #tpu.pipeline_mode<synchronous>, transform_indices = @transform_6, window_bounds = array<i64: 128, 256>}, {pipeline_mode = #tpu.pipeline_mode<synchronous>, transform_indices = @transform_7, window_bounds = array<i64: 1, 256>}, {pipeline_mode = #tpu.pipeline_mode<synchronous>, transform_indices = @transform_8, window_bounds = array<i64: 256, 1>}, {pipeline_mode = #tpu.pipeline_mode<synchronous>, transform_indices = @transform_9, window_bounds = array<i64: 1, 1>}, {transform_indices = @transform_10, window_bounds = array<i64: 1, 8, 128>}]} {
    %c0_i32 = arith.constant 0 : i32
    %0 = arith.cmpi eq, %arg1, %c0_i32 : i32
    %1 = arith.extui %0 : i1 to i32
    %c0_i32_0 = arith.constant 0 : i32
    %2 = arith.cmpi ne, %1, %c0_i32_0 : i32
    scf.if %2 {
      %c0_54 = arith.constant 0 : index
      %c0_55 = arith.constant 0 : index
      %174 = vector.load %arg2[%c0_54, %c0_55] : memref<8x128xf32, #tpu.memory_space<vmem>>, vector<8x128xf32>
      %c0_56 = arith.constant 0 : index
      %c0_57 = arith.constant 0 : index
      %175 = vector.load %arg13[%c0_56, %c0_57] : memref<8x128xf32, #tpu.memory_space<vmem>>, vector<8x128xf32>
      tpu.vector_store %arg13[%c0_56, %c0_57], %174 {strides = array<i32>} : memref<8x128xf32, #tpu.memory_space<vmem>>, vector<8x128xf32>,
    } else {
    }
    %c0 = arith.constant 0 : index
    %c0_1 = arith.constant 0 : index
    %3 = vector.load %arg13[%c0, %c0_1] : memref<8x128xf32, #tpu.memory_space<vmem>>, vector<8x128xf32>
    %c0_2 = arith.constant 0 : index
    %c0_3 = arith.constant 0 : index
    %c0_4 = arith.constant 0 : index
    %4 = vector.load %arg7[%c0_2, %c0_3, %c0_4] : memref<1x8x384xf32, #tpu.memory_space<vmem>>, vector<1x8x384xf32>
    %5 = vector.shape_cast %4 : vector<1x8x384xf32> to vector<8x384xf32>
    %6 = vector.extract_strided_slice %5 {offsets = [0, 0], sizes = [1, 384], strides = [1, 1]} : vector<8x384xf32> to vector<1x384xf32>
    %7 = vector.extract_strided_slice %5 {offsets = [1, 0], sizes = [1, 128], strides = [1, 1]} : vector<8x384xf32> to vector<1x128xf32>
    %8 = vector.extract_strided_slice %5 {offsets = [2, 0], sizes = [1, 128], strides = [1, 1]} : vector<8x384xf32> to vector<1x128xf32>
    %9 = vector.extract_strided_slice %5 {offsets = [3, 0], sizes = [1, 128], strides = [1, 1]} : vector<8x384xf32> to vector<1x128xf32>
    %10 = vector.extract_strided_slice %5 {offsets = [4, 0], sizes = [1, 256], strides = [1, 1]} : vector<8x384xf32> to vector<1x256xf32>
    %11 = vector.extract_strided_slice %5 {offsets = [5, 0], sizes = [1, 128], strides = [1, 1]} : vector<8x384xf32> to vector<1x128xf32>
    %12 = vector.extract_strided_slice %5 {offsets = [6, 0], sizes = [1, 128], strides = [1, 1]} : vector<8x384xf32> to vector<1x128xf32>
    %13 = vector.extract_strided_slice %5 {offsets = [7, 0], sizes = [1, 128], strides = [1, 1]} : vector<8x384xf32> to vector<1x128xf32>
    %14 = arith.truncf %3 : vector<8x128xf32> to vector<8x128xbf16>
    %c0_5 = arith.constant 0 : index
    %c0_6 = arith.constant 0 : index
    %c0_7 = arith.constant 0 : index
    %15 = vector.load %arg3[%c0_5, %c0_6, %c0_7] : memref<1x128x384xbf16, #tpu.memory_space<vmem>>, vector<1x128x384xbf16>
    %16 = vector.shape_cast %15 : vector<1x128x384xbf16> to vector<128x384xbf16>
    %cst = arith.constant dense<0.000000e+00> : vector<8x384xf32>
    %17 = tpu.matmul %14, %16, %cst {dimension_numbers = #tpu.dot_dimension_numbers<[1], [0], [0], [1], [0, 0, 1, 1], [], []>} : vector<8x128xbf16>, vector<128x384xbf16>, vector<8x384xf32> -> vector<8x384xf32>
    %18 = vector.broadcast %6 : vector<1x384xf32> to vector<8x384xf32>
    %19 = arith.addf %17, %18 : vector<8x384xf32>
    %20 = vector.extract_strided_slice %19 {offsets = [0, 0], sizes = [8, 128], strides = [1, 1]} : vector<8x384xf32> to vector<8x128xf32>
    %21 = vector.extract_strided_slice %19 {offsets = [0, 128], sizes = [8, 128], strides = [1, 1]} : vector<8x384xf32> to vector<8x128xf32>
    %22 = vector.extract_strided_slice %19 {offsets = [0, 256], sizes = [8, 128], strides = [1, 1]} : vector<8x384xf32> to vector<8x128xf32>
    %23 = vector.extract_strided_slice %20 {offsets = [0, 0], sizes = [8, 32], strides = [1, 1]} : vector<8x128xf32> to vector<8x32xf32>
    %24 = arith.truncf %23 : vector<8x32xf32> to vector<8x32xbf16>
    %25 = vector.extract_strided_slice %21 {offsets = [0, 0], sizes = [8, 32], strides = [1, 1]} : vector<8x128xf32> to vector<8x32xf32>
    %26 = arith.truncf %25 : vector<8x32xf32> to vector<8x32xbf16>
    %27 = vector.extract_strided_slice %22 {offsets = [0, 0], sizes = [8, 32], strides = [1, 1]} : vector<8x128xf32> to vector<8x32xf32>
    %28 = arith.truncf %27 : vector<8x32xf32> to vector<8x32xbf16>
    %cst_8 = arith.constant dense<0.000000e+00> : vector<8x8xf32>
    %29 = tpu.matmul %24, %26, %cst_8 {dimension_numbers = #tpu.dot_dimension_numbers<[1], [1], [0], [0], [0, 0, 1, 0], [], []>} : vector<8x32xbf16>, vector<8x32xbf16>, vector<8x8xf32> -> vector<8x8xf32>
    %cst_9 = arith.constant 0.176776692 : f32
    %30 = vector.broadcast %cst_9 : f32 to vector<8x8xf32>
    %31 = arith.mulf %29, %30 : vector<8x8xf32>
    %cst_10 = arith.constant dense<0xFF800000> : vector<8xf32>
    %32 = vector.multi_reduction <maximumf>, %31, %cst_10 [1] : vector<8x8xf32> to vector<8xf32>
    %33 = vector.shape_cast %32 : vector<8xf32> to vector<8x1xf32>
    %34 = vector.broadcast %33 : vector<8x1xf32> to vector<8x8xf32>
    %35 = arith.subf %31, %34 : vector<8x8xf32>
    %36 = math.exp %35 : vector<8x8xf32>
    %cst_11 = arith.constant dense<0.000000e+00> : vector<8xf32>
    %37 = vector.multi_reduction <add>, %36, %cst_11 [1] : vector<8x8xf32> to vector<8xf32>
    %38 = vector.shape_cast %37 : vector<8xf32> to vector<8x1xf32>
    %39 = tpu.reciprocal %38 {approx = true} : vector<8x1xf32> -> vector<8x1xf32>
    %40 = vector.broadcast %39 : vector<8x1xf32> to vector<8x8xf32>
    %41 = arith.mulf %36, %40 : vector<8x8xf32>
    %42 = arith.truncf %41 : vector<8x8xf32> to vector<8x8xbf16>
    %cst_12 = arith.constant dense<0.000000e+00> : vector<8x32xf32>
    %43 = tpu.matmul %42, %28, %cst_12 {dimension_numbers = #tpu.dot_dimension_numbers<[1], [0], [0], [1], [0, 0, 1, 1], [], []>} : vector<8x8xbf16>, vector<8x32xbf16>, vector<8x32xf32> -> vector<8x32xf32>
    %44 = vector.extract_strided_slice %20 {offsets = [0, 32], sizes = [8, 32], strides = [1, 1]} : vector<8x128xf32> to vector<8x32xf32>
    %45 = arith.truncf %44 : vector<8x32xf32> to vector<8x32xbf16>
    %46 = vector.extract_strided_slice %21 {offsets = [0, 32], sizes = [8, 32], strides = [1, 1]} : vector<8x128xf32> to vector<8x32xf32>
    %47 = arith.truncf %46 : vector<8x32xf32> to vector<8x32xbf16>
    %48 = vector.extract_strided_slice %22 {offsets = [0, 32], sizes = [8, 32], strides = [1, 1]} : vector<8x128xf32> to vector<8x32xf32>
    %49 = arith.truncf %48 : vector<8x32xf32> to vector<8x32xbf16>
    %cst_13 = arith.constant dense<0.000000e+00> : vector<8x8xf32>
    %50 = tpu.matmul %45, %47, %cst_13 {dimension_numbers = #tpu.dot_dimension_numbers<[1], [1], [0], [0], [0, 0, 1, 0], [], []>} : vector<8x32xbf16>, vector<8x32xbf16>, vector<8x8xf32> -> vector<8x8xf32>
    %cst_14 = arith.constant 0.176776692 : f32
    %51 = vector.broadcast %cst_14 : f32 to vector<8x8xf32>
    %52 = arith.mulf %50, %51 : vector<8x8xf32>
    %cst_15 = arith.constant dense<0xFF800000> : vector<8xf32>
    %53 = vector.multi_reduction <maximumf>, %52, %cst_15 [1] : vector<8x8xf32> to vector<8xf32>
    %54 = vector.shape_cast %53 : vector<8xf32> to vector<8x1xf32>
    %55 = vector.broadcast %54 : vector<8x1xf32> to vector<8x8xf32>
    %56 = arith.subf %52, %55 : vector<8x8xf32>
    %57 = math.exp %56 : vector<8x8xf32>
    %cst_16 = arith.constant dense<0.000000e+00> : vector<8xf32>
    %58 = vector.multi_reduction <add>, %57, %cst_16 [1] : vector<8x8xf32> to vector<8xf32>
    %59 = vector.shape_cast %58 : vector<8xf32> to vector<8x1xf32>
    %60 = tpu.reciprocal %59 {approx = true} : vector<8x1xf32> -> vector<8x1xf32>
    %61 = vector.broadcast %60 : vector<8x1xf32> to vector<8x8xf32>
    %62 = arith.mulf %57, %61 : vector<8x8xf32>
    %63 = arith.truncf %62 : vector<8x8xf32> to vector<8x8xbf16>
    %cst_17 = arith.constant dense<0.000000e+00> : vector<8x32xf32>
    %64 = tpu.matmul %63, %49, %cst_17 {dimension_numbers = #tpu.dot_dimension_numbers<[1], [0], [0], [1], [0, 0, 1, 1], [], []>} : vector<8x8xbf16>, vector<8x32xbf16>, vector<8x32xf32> -> vector<8x32xf32>
    %65 = vector.extract_strided_slice %20 {offsets = [0, 64], sizes = [8, 32], strides = [1, 1]} : vector<8x128xf32> to vector<8x32xf32>
    %66 = arith.truncf %65 : vector<8x32xf32> to vector<8x32xbf16>
    %67 = vector.extract_strided_slice %21 {offsets = [0, 64], sizes = [8, 32], strides = [1, 1]} : vector<8x128xf32> to vector<8x32xf32>
    %68 = arith.truncf %67 : vector<8x32xf32> to vector<8x32xbf16>
    %69 = vector.extract_strided_slice %22 {offsets = [0, 64], sizes = [8, 32], strides = [1, 1]} : vector<8x128xf32> to vector<8x32xf32>
    %70 = arith.truncf %69 : vector<8x32xf32> to vector<8x32xbf16>
    %cst_18 = arith.constant dense<0.000000e+00> : vector<8x8xf32>
    %71 = tpu.matmul %66, %68, %cst_18 {dimension_numbers = #tpu.dot_dimension_numbers<[1], [1], [0], [0], [0, 0, 1, 0], [], []>} : vector<8x32xbf16>, vector<8x32xbf16>, vector<8x8xf32> -> vector<8x8xf32>
    %cst_19 = arith.constant 0.176776692 : f32
    %72 = vector.broadcast %cst_19 : f32 to vector<8x8xf32>
    %73 = arith.mulf %71, %72 : vector<8x8xf32>
    %cst_20 = arith.constant dense<0xFF800000> : vector<8xf32>
    %74 = vector.multi_reduction <maximumf>, %73, %cst_20 [1] : vector<8x8xf32> to vector<8xf32>
    %75 = vector.shape_cast %74 : vector<8xf32> to vector<8x1xf32>
    %76 = vector.broadcast %75 : vector<8x1xf32> to vector<8x8xf32>
    %77 = arith.subf %73, %76 : vector<8x8xf32>
    %78 = math.exp %77 : vector<8x8xf32>
    %cst_21 = arith.constant dense<0.000000e+00> : vector<8xf32>
    %79 = vector.multi_reduction <add>, %78, %cst_21 [1] : vector<8x8xf32> to vector<8xf32>
    %80 = vector.shape_cast %79 : vector<8xf32> to vector<8x1xf32>
    %81 = tpu.reciprocal %80 {approx = true} : vector<8x1xf32> -> vector<8x1xf32>
    %82 = vector.broadcast %81 : vector<8x1xf32> to vector<8x8xf32>
    %83 = arith.mulf %78, %82 : vector<8x8xf32>
    %84 = arith.truncf %83 : vector<8x8xf32> to vector<8x8xbf16>
    %cst_22 = arith.constant dense<0.000000e+00> : vector<8x32xf32>
    %85 = tpu.matmul %84, %70, %cst_22 {dimension_numbers = #tpu.dot_dimension_numbers<[1], [0], [0], [1], [0, 0, 1, 1], [], []>} : vector<8x8xbf16>, vector<8x32xbf16>, vector<8x32xf32> -> vector<8x32xf32>
    %86 = vector.extract_strided_slice %20 {offsets = [0, 96], sizes = [8, 32], strides = [1, 1]} : vector<8x128xf32> to vector<8x32xf32>
    %87 = arith.truncf %86 : vector<8x32xf32> to vector<8x32xbf16>
    %88 = vector.extract_strided_slice %21 {offsets = [0, 96], sizes = [8, 32], strides = [1, 1]} : vector<8x128xf32> to vector<8x32xf32>
    %89 = arith.truncf %88 : vector<8x32xf32> to vector<8x32xbf16>
    %90 = vector.extract_strided_slice %22 {offsets = [0, 96], sizes = [8, 32], strides = [1, 1]} : vector<8x128xf32> to vector<8x32xf32>
    %91 = arith.truncf %90 : vector<8x32xf32> to vector<8x32xbf16>
    %cst_23 = arith.constant dense<0.000000e+00> : vector<8x8xf32>
    %92 = tpu.matmul %87, %89, %cst_23 {dimension_numbers = #tpu.dot_dimension_numbers<[1], [1], [0], [0], [0, 0, 1, 0], [], []>} : vector<8x32xbf16>, vector<8x32xbf16>, vector<8x8xf32> -> vector<8x8xf32>
    %cst_24 = arith.constant 0.176776692 : f32
    %93 = vector.broadcast %cst_24 : f32 to vector<8x8xf32>
    %94 = arith.mulf %92, %93 : vector<8x8xf32>
    %cst_25 = arith.constant dense<0xFF800000> : vector<8xf32>
    %95 = vector.multi_reduction <maximumf>, %94, %cst_25 [1] : vector<8x8xf32> to vector<8xf32>
    %96 = vector.shape_cast %95 : vector<8xf32> to vector<8x1xf32>
    %97 = vector.broadcast %96 : vector<8x1xf32> to vector<8x8xf32>
    %98 = arith.subf %94, %97 : vector<8x8xf32>
    %99 = math.exp %98 : vector<8x8xf32>
    %cst_26 = arith.constant dense<0.000000e+00> : vector<8xf32>
    %100 = vector.multi_reduction <add>, %99, %cst_26 [1] : vector<8x8xf32> to vector<8xf32>
    %101 = vector.shape_cast %100 : vector<8xf32> to vector<8x1xf32>
    %102 = tpu.reciprocal %101 {approx = true} : vector<8x1xf32> -> vector<8x1xf32>
    %103 = vector.broadcast %102 : vector<8x1xf32> to vector<8x8xf32>
    %104 = arith.mulf %99, %103 : vector<8x8xf32>
    %105 = arith.truncf %104 : vector<8x8xf32> to vector<8x8xbf16>
    %cst_27 = arith.constant dense<0.000000e+00> : vector<8x32xf32>
    %106 = tpu.matmul %105, %91, %cst_27 {dimension_numbers = #tpu.dot_dimension_numbers<[1], [0], [0], [1], [0, 0, 1, 1], [], []>} : vector<8x8xbf16>, vector<8x32xbf16>, vector<8x32xf32> -> vector<8x32xf32>
    %107 = tpu.concatenate %43, %64, %85, %106 in 1 : vector<8x32xf32>, vector<8x32xf32>, vector<8x32xf32>, vector<8x32xf32> -> vector<8x128xf32>
    %108 = arith.truncf %107 : vector<8x128xf32> to vector<8x128xbf16>
    %c0_28 = arith.constant 0 : index
    %c0_29 = arith.constant 0 : index
    %c0_30 = arith.constant 0 : index
    %109 = vector.load %arg4[%c0_28, %c0_29, %c0_30] : memref<1x128x128xbf16, #tpu.memory_space<vmem>>, vector<1x128x128xbf16>
    %110 = vector.shape_cast %109 : vector<1x128x128xbf16> to vector<128x128xbf16>
    %cst_31 = arith.constant dense<0.000000e+00> : vector<8x128xf32>
    %111 = tpu.matmul %108, %110, %cst_31 {dimension_numbers = #tpu.dot_dimension_numbers<[1], [0], [0], [1], [0, 0, 1, 1], [], []>} : vector<8x128xbf16>, vector<128x128xbf16>, vector<8x128xf32> -> vector<8x128xf32>
    %112 = vector.broadcast %7 : vector<1x128xf32> to vector<8x128xf32>
    %113 = arith.addf %111, %112 : vector<8x128xf32>
    %114 = arith.addf %3, %113 : vector<8x128xf32>
    %cst_32 = arith.constant dense<0.000000e+00> : vector<8xf32>
    %115 = vector.multi_reduction <add>, %114, %cst_32 [1] : vector<8x128xf32> to vector<8xf32>
    %116 = vector.shape_cast %115 : vector<8xf32> to vector<8x1xf32>
    %cst_33 = arith.constant 1.280000e+02 : f32
    %117 = vector.broadcast %cst_33 : f32 to vector<8x1xf32>
    %118 = arith.divf %116, %117 : vector<8x1xf32>
    %119 = vector.broadcast %118 : vector<8x1xf32> to vector<8x128xf32>
    %120 = arith.subf %114, %119 : vector<8x128xf32>
    %121 = arith.mulf %120, %120 : vector<8x128xf32>
    %cst_34 = arith.constant dense<0.000000e+00> : vector<8xf32>
    %122 = vector.multi_reduction <add>, %121, %cst_34 [1] : vector<8x128xf32> to vector<8xf32>
    %123 = vector.shape_cast %122 : vector<8xf32> to vector<8x1xf32>
    %cst_35 = arith.constant 1.280000e+02 : f32
    %124 = vector.broadcast %cst_35 : f32 to vector<8x1xf32>
    %125 = arith.divf %123, %124 : vector<8x1xf32>
    %cst_36 = arith.constant 9.99999974E-6 : f32
    %126 = vector.broadcast %cst_36 : f32 to vector<8x1xf32>
    %127 = arith.addf %125, %126 : vector<8x1xf32>
    %128 = math.rsqrt %127 : vector<8x1xf32>
    %129 = vector.broadcast %128 : vector<8x1xf32> to vector<8x128xf32>
    %130 = arith.mulf %120, %129 : vector<8x128xf32>
    %131 = vector.broadcast %8 : vector<1x128xf32> to vector<8x128xf32>
    %132 = arith.mulf %130, %131 : vector<8x128xf32>
    %133 = vector.broadcast %9 : vector<1x128xf32> to vector<8x128xf32>
    %134 = arith.addf %132, %133 : vector<8x128xf32>
    %135 = arith.truncf %134 : vector<8x128xf32> to vector<8x128xbf16>
    %c0_37 = arith.constant 0 : index
    %c0_38 = arith.constant 0 : index
    %c0_39 = arith.constant 0 : index
    %136 = vector.load %arg5[%c0_37, %c0_38, %c0_39] : memref<1x128x256xbf16, #tpu.memory_space<vmem>>, vector<1x128x256xbf16>
    %137 = vector.shape_cast %136 : vector<1x128x256xbf16> to vector<128x256xbf16>
    %cst_40 = arith.constant dense<0.000000e+00> : vector<8x256xf32>
    %138 = tpu.matmul %135, %137, %cst_40 {dimension_numbers = #tpu.dot_dimension_numbers<[1], [0], [0], [1], [0, 0, 1, 1], [], []>} : vector<8x128xbf16>, vector<128x256xbf16>, vector<8x256xf32> -> vector<8x256xf32>
    %139 = vector.broadcast %10 : vector<1x256xf32> to vector<8x256xf32>
    %140 = arith.addf %138, %139 : vector<8x256xf32>
    %cst_41 = arith.constant 0.000000e+00 : f32
    %141 = vector.broadcast %cst_41 : f32 to vector<8x256xf32>
    %142 = arith.maximumf %140, %141 : vector<8x256xf32>
    %143 = arith.truncf %142 : vector<8x256xf32> to vector<8x256xbf16>
    %c0_42 = arith.constant 0 : index
    %c0_43 = arith.constant 0 : index
    %c0_44 = arith.constant 0 : index
    %144 = vector.load %arg6[%c0_42, %c0_43, %c0_44] : memref<1x256x128xbf16, #tpu.memory_space<vmem>>, vector<1x256x128xbf16>
    %145 = vector.shape_cast %144 : vector<1x256x128xbf16> to vector<256x128xbf16>
    %cst_45 = arith.constant dense<0.000000e+00> : vector<8x128xf32>
    %146 = tpu.matmul %143, %145, %cst_45 {dimension_numbers = #tpu.dot_dimension_numbers<[1], [0], [0], [1], [0, 0, 1, 1], [], []>} : vector<8x256xbf16>, vector<256x128xbf16>, vector<8x128xf32> -> vector<8x128xf32>
    %147 = vector.broadcast %11 : vector<1x128xf32> to vector<8x128xf32>
    %148 = arith.addf %146, %147 : vector<8x128xf32>
    %149 = arith.addf %134, %148 : vector<8x128xf32>
    %cst_46 = arith.constant dense<0.000000e+00> : vector<8xf32>
    %150 = vector.multi_reduction <add>, %149, %cst_46 [1] : vector<8x128xf32> to vector<8xf32>
    %151 = vector.shape_cast %150 : vector<8xf32> to vector<8x1xf32>
    %cst_47 = arith.constant 1.280000e+02 : f32
    %152 = vector.broadcast %cst_47 : f32 to vector<8x1xf32>
    %153 = arith.divf %151, %152 : vector<8x1xf32>
    %154 = vector.broadcast %153 : vector<8x1xf32> to vector<8x128xf32>
    %155 = arith.subf %149, %154 : vector<8x128xf32>
    %156 = arith.mulf %155, %155 : vector<8x128xf32>
    %cst_48 = arith.constant dense<0.000000e+00> : vector<8xf32>
    %157 = vector.multi_reduction <add>, %156, %cst_48 [1] : vector<8x128xf32> to vector<8xf32>
    %158 = vector.shape_cast %157 : vector<8xf32> to vector<8x1xf32>
    %cst_49 = arith.constant 1.280000e+02 : f32
    %159 = vector.broadcast %cst_49 : f32 to vector<8x1xf32>
    %160 = arith.divf %158, %159 : vector<8x1xf32>
    %cst_50 = arith.constant 9.99999974E-6 : f32
    %161 = vector.broadcast %cst_50 : f32 to vector<8x1xf32>
    %162 = arith.addf %160, %161 : vector<8x1xf32>
    %163 = math.rsqrt %162 : vector<8x1xf32>
    %164 = vector.broadcast %163 : vector<8x1xf32> to vector<8x128xf32>
    %165 = arith.mulf %155, %164 : vector<8x128xf32>
    %166 = vector.broadcast %12 : vector<1x128xf32> to vector<8x128xf32>
    %167 = arith.mulf %165, %166 : vector<8x128xf32>
    %168 = vector.broadcast %13 : vector<1x128xf32> to vector<8x128xf32>
    %169 = arith.addf %167, %168 : vector<8x128xf32>
    %c0_51 = arith.constant 0 : index
    %c0_52 = arith.constant 0 : index
    %170 = vector.load %arg13[%c0_51, %c0_52] : memref<8x128xf32, #tpu.memory_space<vmem>>, vector<8x128xf32>
    tpu.vector_store %arg13[%c0_51, %c0_52], %169 {strides = array<i32>} : memref<8x128xf32, #tpu.memory_space<vmem>>, vector<8x128xf32>,
    %c1_i32 = arith.constant 1 : i32
    %171 = arith.cmpi eq, %arg1, %c1_i32 : i32
    %172 = arith.extui %171 : i1 to i32
    %c0_i32_53 = arith.constant 0 : i32
    %173 = arith.cmpi ne, %172, %c0_i32_53 : i32
    scf.if %173 {
      %174 = vector.extract_strided_slice %169 {offsets = [7, 0], sizes = [1, 128], strides = [1, 1]} : vector<8x128xf32> to vector<1x128xf32>
      %175 = vector.shape_cast %174 : vector<1x128xf32> to vector<1x128xf32>
      %176 = vector.broadcast %175 : vector<1x128xf32> to vector<8x128xf32>
      %177 = arith.truncf %176 : vector<8x128xf32> to vector<8x128xbf16>
      %c0_54 = arith.constant 0 : index
      %c0_55 = arith.constant 0 : index
      %178 = vector.load %arg8[%c0_54, %c0_55] : memref<128x256xbf16, #tpu.memory_space<vmem>>, vector<128x256xbf16>
      %cst_56 = arith.constant dense<0.000000e+00> : vector<8x256xf32>
      %179 = tpu.matmul %177, %178, %cst_56 {dimension_numbers = #tpu.dot_dimension_numbers<[1], [0], [0], [1], [0, 0, 1, 1], [], []>} : vector<8x128xbf16>, vector<128x256xbf16>, vector<8x256xf32> -> vector<8x256xf32>
      %c0_57 = arith.constant 0 : index
      %c0_58 = arith.constant 0 : index
      %180 = vector.load %arg9[%c0_57, %c0_58] : memref<1x256xf32, #tpu.memory_space<vmem>>, vector<1x256xf32>
      %181 = vector.broadcast %180 : vector<1x256xf32> to vector<8x256xf32>
      %182 = arith.addf %179, %181 : vector<8x256xf32>
      %cst_59 = arith.constant 0.000000e+00 : f32
      %183 = vector.broadcast %cst_59 : f32 to vector<8x256xf32>
      %184 = arith.maximumf %182, %183 : vector<8x256xf32>
      %185 = arith.truncf %184 : vector<8x256xf32> to vector<8x256xbf16>
      %c0_60 = arith.constant 0 : index
      %c0_61 = arith.constant 0 : index
      %186 = vector.load %arg10[%c0_60, %c0_61] : memref<256x1xbf16, #tpu.memory_space<vmem>>, vector<256x1xbf16>
      %cst_62 = arith.constant dense<0.000000e+00> : vector<8x1xf32>
      %187 = tpu.matmul %185, %186, %cst_62 {dimension_numbers = #tpu.dot_dimension_numbers<[1], [0], [0], [1], [0, 0, 1, 1], [], []>} : vector<8x256xbf16>, vector<256x1xbf16>, vector<8x1xf32> -> vector<8x1xf32>
      %c0_63 = arith.constant 0 : index
      %c0_64 = arith.constant 0 : index
      %188 = vector.load %arg11[%c0_63, %c0_64] : memref<1x1xf32, #tpu.memory_space<vmem>>, vector<1x1xf32>
      %189 = vector.broadcast %188 : vector<1x1xf32> to vector<8x1xf32>
      %190 = arith.addf %187, %189 : vector<8x1xf32>
      %191 = vector.shape_cast %190 : vector<8x1xf32> to vector<8x1xf32>
      %192 = vector.broadcast %191 : vector<8x1xf32> to vector<8x128xf32>
      %c0_65 = arith.constant 0 : index
      %c0_66 = arith.constant 0 : index
      %c0_67 = arith.constant 0 : index
      %193 = vector.load %arg12[%c0_65, %c0_66, %c0_67] : memref<1x8x128xf32, #tpu.memory_space<vmem>>, vector<1x8x128xf32>
      %194 = vector.shape_cast %193 : vector<1x8x128xf32> to vector<8x128xf32>
      %195 = vector.shape_cast %192 : vector<8x128xf32> to vector<1x8x128xf32>
      tpu.vector_store %arg12[%c0_65, %c0_66, %c0_67], %195 {strides = array<i32>} : memref<1x8x128xf32, #tpu.memory_space<vmem>>, vector<1x8x128xf32>,
    } else {
    }
    return
  }
  func.func @transform_0(%arg0: i32, %arg1: i32) -> (i32, i32) {
    %c0_i32 = arith.constant 0 : i32
    %c0_i32_0 = arith.constant 0 : i32
    return %arg0, %c0_i32 : i32, i32
  }
  func.func @transform_1(%arg0: i32, %arg1: i32) -> (i32, i32, i32) {
    %c0_i32 = arith.constant 0 : i32
    %c0_i32_0 = arith.constant 0 : i32
    %c0_i32_1 = arith.constant 0 : i32
    return %arg1, %c0_i32, %c0_i32_0 : i32, i32, i32
  }
  func.func @transform_2(%arg0: i32, %arg1: i32) -> (i32, i32, i32) {
    %c0_i32 = arith.constant 0 : i32
    %c0_i32_0 = arith.constant 0 : i32
    %c0_i32_1 = arith.constant 0 : i32
    return %arg1, %c0_i32, %c0_i32_0 : i32, i32, i32
  }
  func.func @transform_3(%arg0: i32, %arg1: i32) -> (i32, i32, i32) {
    %c0_i32 = arith.constant 0 : i32
    %c0_i32_0 = arith.constant 0 : i32
    %c0_i32_1 = arith.constant 0 : i32
    return %arg1, %c0_i32, %c0_i32_0 : i32, i32, i32
  }
  func.func @transform_4(%arg0: i32, %arg1: i32) -> (i32, i32, i32) {
    %c0_i32 = arith.constant 0 : i32
    %c0_i32_0 = arith.constant 0 : i32
    %c0_i32_1 = arith.constant 0 : i32
    return %arg1, %c0_i32, %c0_i32_0 : i32, i32, i32
  }
  func.func @transform_5(%arg0: i32, %arg1: i32) -> (i32, i32, i32) {
    %c0_i32 = arith.constant 0 : i32
    %c0_i32_0 = arith.constant 0 : i32
    %c0_i32_1 = arith.constant 0 : i32
    return %arg1, %c0_i32, %c0_i32_0 : i32, i32, i32
  }
  func.func @transform_6(%arg0: i32, %arg1: i32) -> (i32, i32) {
    %c0_i32 = arith.constant 0 : i32
    %c0_i32_0 = arith.constant 0 : i32
    %c0_i32_1 = arith.constant 0 : i32
    return %c0_i32, %c0_i32_0 : i32, i32
  }
  func.func @transform_7(%arg0: i32, %arg1: i32) -> (i32, i32) {
    %c0_i32 = arith.constant 0 : i32
    %c0_i32_0 = arith.constant 0 : i32
    %c0_i32_1 = arith.constant 0 : i32
    return %c0_i32, %c0_i32_0 : i32, i32
  }
  func.func @transform_8(%arg0: i32, %arg1: i32) -> (i32, i32) {
    %c0_i32 = arith.constant 0 : i32
    %c0_i32_0 = arith.constant 0 : i32
    %c0_i32_1 = arith.constant 0 : i32
    return %c0_i32, %c0_i32_0 : i32, i32
  }
  func.func @transform_9(%arg0: i32, %arg1: i32) -> (i32, i32) {
    %c0_i32 = arith.constant 0 : i32
    %c0_i32_0 = arith.constant 0 : i32
    %c0_i32_1 = arith.constant 0 : i32
    return %c0_i32, %c0_i32_0 : i32, i32
  }
  func.func @transform_10(%arg0: i32, %arg1: i32) -> (i32, i32, i32) {
    %c0_i32 = arith.constant 0 : i32
    %c0_i32_0 = arith.constant 0 : i32
    %c0_i32_1 = arith.constant 0 : i32
    return %arg0, %c0_i32, %c0_i32_0 : i32, i32, i32
  }
}

</mosaic_0001>

<bundles_post_ra>
// kernel: sea_ice_transformer.2
= control target key start
LH: loop header
LB: loop body
LE: loop exit
PB: predicated region body
PF: predicated region fallthrough
CT: control target
= control target key end

     0   :  { %s725_s12 = smov 0   ;;  %s727_s13 = smov 0   ;;  %s826_s0 = inlined_call_operand.vmem [shape: bf16[16,1024], index: 0, kind: input, shape index: {}]   ;;  %s827_s1 = inlined_call_operand.vmem [shape: bf16[1024,128], index: 1, kind: input, shape index: {}]   ;;  %s828_s2 = inlined_call_operand.vmem [shape: f32[1,128], index: 2, kind: input, shape index: {}]   ;;  %s829_s3 = inlined_call_operand.vmem [shape: f32[16,128], index: 3, kind: output, shape index: {}]  }
   0x1   :  { %s729_s14 = smov 0   ;;  %s731_s15 = smov 0  }
   0x2   :  { %s733_s16 = smov 0  }
   0x3 LB: > { %s22_s17 = sadd.s32 1, %s698_s15  ;;  %p41_p1 = scmp.ne.s32.totalorder %s690_s13, %s686_s12  ;;  %s702_s16 = sphi %s733_s16, %s13_s16   ;;  %s698_s15 = sphi %s731_s15, %s833_s15   ;;  %s694_s14 = sphi %s729_s14, %s832_s14   ;;  %s690_s13 = sphi %s727_s13, %s831_s13   ;;  %s686_s12 = sphi %s725_s12, %s830_s12  }
   0x4   : > { %p23_p0 = scmp.ge.s32.totalorder %s22_s17, 4  ;;  %p42_p2 = scmp.eq.s32.totalorder %s702_s16, 0 }
   0x5   : > { %s34_s19 = sadd.s32 1, %s690_s13  ;;  %p548_p5 = scmp.ge.s32.totalorder %s702_s16, 4 }
   0x6   : > { %s835_s17 = smov (%p23_p0, %s22_s17), 0  ;;  %p43_p3 = por %p42_p2, %p41_p1 }
   0x7   : > { %s30_s18 = ssub.s32 %s698_s15, %s835_s17  ;;  %143 = sbr.rel (%p548_p5) target bundleno = 21 (0x15), region = 20 }
   0x8   : > { %p32_p4 = scmp.eq.s32.totalorder %s30_s18, 0 }
   0xa   : > { %s760_s20 = scalar_select %p32_p4, %s690_s13, %s34_s19  }
   0xe   : > { %146 = sbr.rel (!%p43_p3) target bundleno = 21 (0x15), region = 24  ;;  %s148_s21 = sand.u32 (%p43_p3), 1, %s690_s13  }
   0xf   : > { %s581_s22 = sshll.u32 (%p43_p3), %s698_s15, 3  ;;  %s549_s23 = sshll.u32 (%p43_p3), %s148_s21, 4 }
  0x10   : > { %s156_s26 = scalar_lea.vmem (%p43_p3), %s826_s0, %s581_s22  ;;  %s150_s27 = scalar_lea.vmem (%p43_p3), [#allocation3], %s549_s23 }
  0x11   : > { %v186_v0 = vld [vmem:[%s156_s26] sm:$0xff] (%p43_p3) }
  0x12   : > { %v188_v1 = vld [vmem:[%s156_s26 + $0x20] sm:$0xff] (%p43_p3)  ;;  %187 = vst [vmem:[%s150_s27] sm:$0xff] (%p43_p3), %v186_v0 }
  0x13   : > { %189 = vst [vmem:[%s150_s27 + $0x8] sm:$0xff] (%p43_p3), %v188_v1 }
  0x15 PF: > { %p552_p6 = scmp.ge.s32.totalorder %s702_s16, 1  ;;  %p203_p7 = scmp.lt.s32.totalorder %s702_s16, 5 }
  0x17   : > { %p204_p8 = pnand %p552_p6, %p203_p7 }
  0x18   : > { %s210_s28 = sand.u32 (!%p204_p8), 1, %s686_s12   ;;  %s554_s29 = sshll.u32 (!%p204_p8), %s694_s14, 5 }
  0x19   : > { %207 = sbr.rel (%p204_p8) target bundleno = 302 (0x12e), region = 66  ;;  %s772_s30 = sshll.u32 (!%p204_p8), %s210_s28, 4 }
  0x1a   : > { %p241_p9 = scmp.lt.s32.totalorder (!%p204_p8), %s554_s29, 127  ;;  %s212_s8 = scalar_lea.vmem (!%p204_p8), [#allocation3], %s772_s30 }
  0x1b   : > { %p556_p10 = scmp.ne.s32.totalorder (!%p204_p8), %s694_s14, 0 }
  0x20   : > { %s837_s29 = smov (!%p241_p9, %s554_s29), 127  ;;  %256 = sbr.rel (%p556_p10) target bundleno = 39 (0x27), region = 74 }
  0x21   : > { %s555_s4 = sshll.u32 %s837_s29, 2  ;;  %v704_v2 = vmov (!%p556_p10), 0.0  }
  0x22   : > { %s777_s7 = scalar_lea.vmem %s827_s1, %s555_s4  ;;  %257 = vst [vmem:[#allocation2] sm:$0xff] (!%p556_p10), %v704_v2  ;;  %258 = vst [vmem:[#allocation2 + $0x8] sm:$0xff] (!%p556_p10), %v704_v2 }
  0x27 PF: > { %v645_v3 = vld [vmem:[%s777_s7 + $0x40] sm:$0xff]   ;;  %v647_v5 = vld [vmem:[%s777_s7 + $0x48] sm:$0xff]   ;;  %v649_v7 = vld [vmem:[%s777_s7 + $0x50] sm:$0xff]   ;;  %p575_p11 = scmp.ne.s32.totalorder %s694_s14, 3 }
  0x28   : > { %v646_v4 = vld [vmem:[%s777_s7] sm:$0xff]   ;;  %582 = vmatprep.subr.bf16.mxu0 %v645_v3  ;;  %v648_v6 = vld [vmem:[%s777_s7 + $0x8] sm:$0xff]   ;;  %v650_v8 = vld [vmem:[%s777_s7 + $0x10] sm:$0xff]  }
  0x29   : > { %583 = vmatpush3.bf16.msra.mxu0 %v646_v4  ;;  %v651_v9 = vld [vmem:[%s777_s7 + $0x58] sm:$0xff]   ;;  %v653_v11 = vld [vmem:[%s777_s7 + $0x60] sm:$0xff]   ;;  %v655_v13 = vld [vmem:[%s777_s7 + $0x68] sm:$0xff]  }
  0x2a   : > { %584 = vmatprep.subr.bf16.mxu0 %v647_v5  ;;  %v652_v10 = vld [vmem:[%s777_s7 + $0x18] sm:$0xff]   ;;  %v654_v12 = vld [vmem:[%s777_s7 + $0x20] sm:$0xff]   ;;  %v656_v15 = vld [vmem:[%s777_s7 + $0x28] sm:$0xff]  }
  0x2b   : > { %v663_v14 = vld [vmem:[%s212_s8 + $0x4] ss:$8 sps:$4 sm:$0xff]   ;;  %v661_v20 = vld [vmem:[%s212_s8] ss:$8 sps:$4 sm:$0xff]  }
  0x2c   : > { %433 = vmatprep.mubr.bf16.mxu0 %v663_v14  ;;  %v657_v16 = vld [vmem:[%s777_s7 + $0x70] sm:$0xff]   ;;  %v659_v18 = vld [vmem:[%s777_s7 + $0x78] sm:$0xff]   ;;  %v259_v22 = vld [vmem:[#allocation2] sm:$0xff] }
  0x2d   : > { %585 = vmatpush3.bf16.msra.mxu0 %v648_v6  ;;  %v658_v17 = vld [vmem:[%s777_s7 + $0x30] sm:$0xff]   ;;  %v660_v19 = vld [vmem:[%s777_s7 + $0x38] sm:$0xff]   ;;  %v260_v26 = vld [vmem:[#allocation2 + $0x8] sm:$0xff] }
  0x2e   : > { %586 = vmatprep.subr.bf16.mxu0 %v649_v7  ;;  %v576_v32 = vld [vmem:[%s828_s2] ss:$0 sm:$0xff] (!%p575_p11) }
  0x31   : > { %587 = vmatpush3.bf16.msra.mxu0 %v650_v8 }
  0x32   : > { %588 = vmatprep.subr.bf16.mxu0 %v651_v9 }
  0x35   : > { %589 = vmatpush3.bf16.msra.mxu0 %v652_v10 }
  0x36   : > { %590 = vmatprep.subr.bf16.mxu0 %v653_v11 }
  0x39   : > { %591 = vmatpush3.bf16.msra.mxu0 %v654_v12 }
  0x3a   : > { %592 = vmatprep.subr.bf16.mxu0 %v655_v13 }
  0x3d   : > { %593 = vmatpush3.bf16.msra.mxu0 %v656_v15 }
  0x3e   : > { %594 = vmatprep.subr.bf16.mxu0 %v657_v16 }
  0x41   : > { %595 = vmatpush3.bf16.msra.mxu0 %v658_v17 }
  0x42   : > { %596 = vmatprep.subr.bf16.mxu0 %v659_v18 }
  0x45   : > { %597 = vmatpush3.bf16.msra.mxu0 %v660_v19 }
  0x48   : > { %434 = vmatmul.mubr.bf16.vlgmr.msra.gmra.mrb[0].mxu0 %v661_v20 }
 0x11b   : > { %v598_v21 = vpop.f32.mrb[0].mxu0 }
 0x11c   : > { %v599_v23 = vpop.f32.mrb[1].mxu0 }
 0x11d   : > { %v600_v24 = vadd.f32 %v599_v23, %v598_v21  ;;  %v601_v25 = vpop.f32.mrb[2].mxu0  ;;  %449 = sbr.rel (%p575_p11) target bundleno = 302 (0x12e), region = 78 }
 0x11e   : > { %v602_v27 = vpop.f32.mrb[3].mxu0 }
 0x11f   : > { %v442_v28 = vadd.f32 %v600_v24, %v259_v22  ;;  %v603_v29 = vadd.f32 %v602_v27, %v601_v25 }
 0x121   : > { %444 = vst [vmem:[#allocation2] sm:$0xff] %v442_v28  ;;  %v443_v30 = vadd.f32 %v603_v29, %v260_v26 }
 0x123   : > { %445 = vst [vmem:[#allocation2 + $0x8] sm:$0xff] %v443_v30 }
 0x128   : > { %v450_v31 = vld [vmem:[#allocation2] sm:$0xff] }
 0x129   : > { %v459_v34 = vadd.f32 %v576_v32, %v450_v31 }
 0x12a   : > { %v451_v33 = vld [vmem:[#allocation2 + $0x8] sm:$0xff] }
 0x12b   : > { %v460_v35 = vadd.f32 %v576_v32, %v451_v33  ;;  %461 = vst [vmem:[%s829_s3] sm:$0xff] %v459_v34 }
 0x12d   : > { %462 = vst [vmem:[%s829_s3 + $0x8] sm:$0xff] %v460_v35 }
 0x12e PF: > { %s13_s16 = sadd.s32 1, %s702_s16   ;;  %s830_s12 = smov %s690_s13 }
 0x12f   : > { %p10_p12 = scmp.ge.s32.totalorder %s13_s16, 6   ;;  %s831_s13 = smov %s760_s20 }
 0x130   : > { %s832_s14 = smov %s698_s15  ;;  %s833_s15 = smov %s835_s17 }
 0x131   :  { %12 = sbr.rel (!%p10_p12) target bundleno = 3 (0x3), region = 116 }

// kernel: sea_ice_transformer.3
= control target key start
LH: loop header
LB: loop body
LE: loop exit
PB: predicated region body
PF: predicated region fallthrough
CT: control target
= control target key end

     0   :  { %s2730_s15 = smov 0   ;;  %s2732_s16 = smov 0   ;;  %s3112_s0 = inlined_call_operand.vmem [shape: f32[16,128], index: 0, kind: input, shape index: {}]   ;;  %s3113_s1 = inlined_call_operand.vmem [shape: bf16[2,128,384], index: 1, kind: input, shape index: {}]   ;;  %s3114_s2 = inlined_call_operand.vmem [shape: bf16[2,128,128], index: 2, kind: input, shape index: {}]   ;;  %s3115_s3 = inlined_call_operand.vmem [shape: bf16[2,128,256], index: 3, kind: input, shape index: {}]   ;;  %s3116_s4 = inlined_call_operand.vmem [shape: bf16[2,256,128], index: 4, kind: input, shape index: {}]   ;;  %s3117_s5 = inlined_call_operand.vmem [shape: f32[2,8,384], index: 5, kind: input, shape index: {}]   ;;  %s3118_s6 = inlined_call_operand.vmem [shape: bf16[128,256], index: 6, kind: input, shape index: {}]   ;;  %s3119_s7 = inlined_call_operand.vmem [shape: f32[1,256], index: 7, kind: input, shape index: {}]   ;;  %s3120_s8 = inlined_call_operand.vmem [shape: bf16[256,1], index: 8, kind: input, shape index: {}]   ;;  %s3121_s9 = inlined_call_operand.<no memory space> [shape: f32[1,1], index: 9, kind: input, shape index: {}]   ;;  %s3122_s10 = inlined_call_operand.vmem [shape: f32[2,8,128], index: 10, kind: output, shape index: {}]  }
   0x1   :  { %3125 = sst [smem:[#allocation8_spill]] %s3112_s0  ;;  %v15_v0 = vstv %s3121_s9  ;;  %s2734_s17 = smov 0  }
   0x2   :  { %16 = vst [vmem:[#allocation3] sm:$0x1] %v15_v0  ;;  %s2736_s18 = smov 0   ;;  %s2738_s19 = smov 0  }
   0x3 LB: > { %3126 = sst [smem:[#allocation4_spill]] %s2655_s17  ;;  %s31_s9 = sadd.s32 1, %s2655_s17  ;;  %s2663_s19 = sphi %s2738_s19, %s22_s19   ;;  %s2659_s18 = sphi %s2736_s18, %s3134_s18   ;;  %s2655_s17 = sphi %s2734_s17, %s3133_s17   ;;  %s2651_s16 = sphi %s2732_s16, %s3132_s16   ;;  %s2647_s15 = sphi %s2730_s15, %s3131_s15  }
   0x4   : > { %3127 = sst [smem:[#allocation5_spill]] %s2659_s18  ;;  %s34_s20 = sadd.s32 1, %s2659_s18 }
   0x5   : > { %p32_p0 = scmp.ge.s32.totalorder %s31_s9, 2  ;;  %p2146_p1 = scmp.ge.s32.totalorder %s2663_s19, 1 }
   0x6   : > { %p375_p2 = scmp.lt.s32.totalorder %s2663_s19, 5 }
   0x7   : > { %s3136_s9 = smov (%p32_p0, %s31_s9), 0  ;;  %s3138_s20 = smov (!%p32_p0, %s34_s20), %s2659_s18 }
   0x8   : > { %3128 = sst [smem:[#allocation6_spill]] %s3136_s9  ;;  %p376_p3 = pnand %p2146_p1, %p375_p2 }
   0x9   : > { %p36_p4 = scmp.ge.s32.totalorder %s3138_s20, 2  ;;  %p436_p5 = scmp.lt.s32.totalorder (!%p376_p3), %s2651_s16, 1 }
   0xa   : > { %379 = sbr.rel (%p376_p3) target bundleno = 3562 (0xdea), region = 60  ;;  %p440_p6 = scmp.lt.s32.totalorder (!%p376_p3), %s2647_s15, 1 }
   0xb   : > { %s3140_s20 = smov (%p36_p4, %s3138_s20), 0  ;;  %s3130_s0 = sld [smem:[#allocation8_spill]] (!%p376_p3) }
   0xc   : > { %3129 = sst [smem:[#allocation7_spill]] %s3140_s20  ;;  %p2157_p7 = scmp.ne.s32.totalorder (!%p376_p3), %s2647_s15, 0 }
  0x11   : > { %s3142_s16 = smov (!%p436_p5, %s2651_s16), 1 }
  0x12   : > { %s441_s21 = scalar_select %p440_p6, %s2647_s15, 1 }
  0x13   : > { %s2147_s22 = sshll.u32 %s3142_s16, 3 }
  0x14   : > { %s439_s25 = scalar_lea.vmem %s3130_s0, %s2147_s22  ;;  %s2435_s26 = smul.u32 192, %s441_s21 }
  0x15   : > { %s2266_s27 = sshll.u32 %s441_s21, 6  ;;  %s2267_s28 = sshll.u32 %s441_s21, 7  ;;  %v474_v1 = vld [vmem:[%s439_s25] sm:$0xff] (!%p2157_p7) }
  0x16   : > { %s2770_s11 = scalar_lea.vmem %s3113_s1, %s2435_s26  ;;  %s2775_s14 = scalar_lea.vmem %s3114_s2, %s2266_s27  ;;  %475 = vst [vmem:[#allocation2] sm:$0xff] (!%p2157_p7), %v474_v1 }
  0x17   : > { %s2780_s16 = scalar_lea.vmem %s3115_s3, %s2267_s28  ;;  %s2785_s0 = scalar_lea.vmem %s3116_s4, %s2267_s28 }
  0x18   : > { %s2436_s18 = smul.u32 24, %s441_s21  ;;  %s2790_s26 = scalar_lea.vmem %s3122_s10, %s2147_s22 }
  0x19   : > { %473 = sbr.rel (%p2157_p7) target bundleno = 32 (0x20), region = 64 }
  0x1a   : > { %s2795_s27 = scalar_lea.vmem %s3117_s5, %s2436_s18 }
  0x20 PF: > { %v2484_v2 = vld [vmem:[%s2770_s11 + $0x4] ss:$12 sps:$4 sm:$0xff]   ;;  %v2486_v3 = vld [vmem:[%s2770_s11] ss:$12 sps:$4 sm:$0xff]   ;;  %v2665_v4 = vmov 0   ;;  %v2666_v5 = vmov 0.0   ;;  %v513_v30 = vlaneseq }
  0x21   : > { %685 = vmatprep.mubr.bf16.mxu0 %v2665_v4  ;;  %2347 = vmatprep.subr.bf16.mxu1 %v2666_v5  ;;  %v2487_v6 = vld [vmem:[%s2770_s11 + $0x1c] ss:$12 sps:$4 sm:$0xff]   ;;  %v2489_v7 = vld [vmem:[%s2770_s11 + $0x18] ss:$12 sps:$4 sm:$0xff]   ;;  %v2490_v8 = vld [vmem:[%s2770_s11 + $0x34] ss:$12 sps:$4 sm:$0xff]  }
  0x22   : > { %653 = vmatprep.subr.bf16.mxu0 %v2484_v2  ;;  %v2492_v9 = vld [vmem:[%s2770_s11 + $0x30] ss:$12 sps:$4 sm:$0xff]   ;;  %v2493_v10 = vld [vmem:[%s2770_s11 + $0x4c] ss:$12 sps:$4 sm:$0xff]   ;;  %v2495_v11 = vld [vmem:[%s2770_s11 + $0x48] ss:$12 sps:$4 sm:$0xff]  }
  0x23   : > { %654 = vmatpush1.bf16.msra.mxu0 %v2486_v3  ;;  %v2508_v12 = vld [vmem:[%s2770_s11 + $0x8] ss:$12 sps:$4 sm:$0xff]   ;;  %v2496_v13 = vld [vmem:[%s2770_s11 + $0x64] ss:$12 sps:$4 sm:$0xff]   ;;  %v2509_v14 = vld [vmem:[%s2770_s11 + $0x20] ss:$12 sps:$4 sm:$0xff]  }
  0x24   : > { %655 = vmatprep.subr.bf16.mxu0 %v2487_v6  ;;  %2348 = vmatpush3.bf16.msra.mxu1 %v2508_v12  ;;  %v2498_v15 = vld [vmem:[%s2770_s11 + $0x60] ss:$12 sps:$4 sm:$0xff]   ;;  %v2499_v16 = vld [vmem:[%s2770_s11 + $0x7c] ss:$12 sps:$4 sm:$0xff]   ;;  %v2501_v17 = vld [vmem:[%s2770_s11 + $0x78] ss:$12 sps:$4 sm:$0xff]  }
  0x25   : > { %2349 = vmatprep.subr.bf16.mxu1 %v2666_v5  ;;  %v2510_v18 = vld [vmem:[%s2770_s11 + $0x38] ss:$12 sps:$4 sm:$0xff]   ;;  %v2502_v19 = vld [vmem:[%s2770_s11 + $0x94] ss:$12 sps:$4 sm:$0xff]   ;;  %v2511_v20 = vld [vmem:[%s2770_s11 + $0x50] ss:$12 sps:$4 sm:$0xff]  }
  0x26   : > { %v2504_v21 = vld [vmem:[%s2770_s11 + $0x90] ss:$12 sps:$4 sm:$0xff]   ;;  %v2505_v22 = vld [vmem:[%s2770_s11 + $0xac] ss:$12 sps:$4 sm:$0xff]   ;;  %v2512_v23 = vld [vmem:[%s2770_s11 + $0x68] ss:$12 sps:$4 sm:$0xff]  }
  0x27   : > { %656 = vmatpush1.bf16.msra.mxu0 %v2489_v7  ;;  %v2507_v24 = vld [vmem:[%s2770_s11 + $0xa8] ss:$12 sps:$4 sm:$0xff]   ;;  %v2824_v25 = vld [vmem:[#allocation2] sm:$0xff]  ;;  %v2515_v29 = vld [vmem:[%s2770_s11 + $0xb0] ss:$12 sps:$4 sm:$0xff]   ;;  %vm2667_vm0 = vmmov 0  }
  0x28   : > { %657 = vmatprep.subr.bf16.mxu0 %v2490_v8  ;;  %2350 = vmatpush3.bf16.msra.mxu1 %v2509_v14  ;;  %v2513_v26 = vld [vmem:[%s2770_s11 + $0x80] ss:$12 sps:$4 sm:$0xff]   ;;  %v480_v27 = vpack.c.bf16 %v2824_v25, %v2824_v25  ;;  %v2514_v28 = vld [vmem:[%s2770_s11 + $0x98] ss:$12 sps:$4 sm:$0xff]   ;;  %v2843_v31 = vshrl.u32 %v513_v30, 7  ;;  %vm737_vm1 = vcmask 261120  }
  0x29   : > { %2351 = vmatprep.subr.bf16.mxu1 %v2666_v5  ;;  %2363 = vmatprep.mubr.msk.bf16.mxu1 %vm2667_vm0, %v2666_v5  ;;  %v2849_v33 = vld [vmem:[%s2795_s27 + $0x8] sm:$0xff]  ;;  %v2852_v34 = vld [vmem:[%s2795_s27] sm:$0xff]  ;;  %s2668_s17 = smov 96   ;;  %s2669_s18 = smov 64   ;;  %v479_v46 = vld [vmem:[%s2795_s27 + $0x10] sm:$0xff]  ;;  %vm801_vm2 = vcmask 1043456  }
  0x2a   : > { %v2846_v32 = vsub.s32 0, %v2843_v31  ;;  %s2670_s9 = smov 32   ;;  %vm785_vm3 = vcmask 64512   ;;  %vm1194_vm4 = vcmask 523264   ;;  %vm1196_vm5 = vcmask 785408   ;;  %p2230_p8 = scmp.ne.s32.totalorder %s2647_s15, 1 }
  0x2b   : > { %658 = vmatpush1.bf16.msra.mxu0 %v2492_v9 }
  0x2c   : > { %659 = vmatprep.subr.bf16.mxu0 %v2493_v10  ;;  %2352 = vmatpush3.bf16.msra.mxu1 %v2510_v18  ;;  %v520_v35 = vrot.slane %v2849_v33, %v2846_v32  ;;  %v516_v36 = vrot.slane %v2852_v34, %v2846_v32  ;;  %v524_v47 = vrot.slane %v479_v46, %v2846_v32 }
  0x2d   : > { %2353 = vmatprep.subr.bf16.mxu1 %v2666_v5 }
  0x2f   : > { %660 = vmatpush1.bf16.msra.mxu0 %v2495_v11 }
  0x30   : > { %661 = vmatprep.subr.bf16.mxu0 %v2496_v13  ;;  %2354 = vmatpush3.bf16.msra.mxu1 %v2511_v20 }
  0x31   : > { %2355 = vmatprep.subr.bf16.mxu1 %v2666_v5 }
  0x33   : > { %662 = vmatpush1.bf16.msra.mxu0 %v2498_v15 }
  0x34   : > { %663 = vmatprep.subr.bf16.mxu0 %v2499_v16  ;;  %2356 = vmatpush3.bf16.msra.mxu1 %v2512_v23 }
  0x35   : > { %2357 = vmatprep.subr.bf16.mxu1 %v2666_v5 }
  0x37   : > { %664 = vmatpush1.bf16.msra.mxu0 %v2501_v17 }
  0x38   : > { %665 = vmatprep.subr.bf16.mxu0 %v2502_v19  ;;  %2358 = vmatpush3.bf16.msra.mxu1 %v2513_v26 }
  0x39   : > { %2359 = vmatprep.subr.bf16.mxu1 %v2666_v5 }
  0x3b   : > { %666 = vmatpush1.bf16.msra.mxu0 %v2504_v21 }
  0x3c   : > { %667 = vmatprep.subr.bf16.mxu0 %v2505_v22  ;;  %2360 = vmatpush3.bf16.msra.mxu1 %v2514_v28 }
  0x3d   : > { %2361 = vmatprep.subr.bf16.mxu1 %v2666_v5 }
  0x3f   : > { %668 = vmatpush1.bf16.msra.mxu0 %v2507_v24 }
  0x40   : > { %2391 = vmatprep.subr.bf16.mxu0 %v2666_v5  ;;  %2362 = vmatpush3.bf16.msra.mxu1 %v2515_v29 }
  0x41   : > { %2367 = vmatprep.subr.bf16.mxu1 %v2666_v5 }
  0x42   : > { %686 = vmatmul.mubr.bf16.vlgmr.msra.gmra.mrb[0].mxu0 %v480_v27 }
  0x43   : > { %2393 = vmatprep.mubr.msk.bf16.mxu0 %vm2667_vm0, %v2666_v5  ;;  %2364 = vmatmul.mubr.bf16.vlgmr.msra.gmra.mrb[0].mxu1 %v480_v27 }
  0x44   : > { %2369 = vmatprep.mubr.msk.bf16.mxu1 %vm2667_vm0, %v2666_v5 }
 0x115   : > { %v687_v37 = vpop.f32.mrb[0].mxu0 }
 0x116   : > { %v689_v38 = vpop.f32.mrb[1].mxu0  ;;  %v688_v42 = vadd.f32 %v687_v37, %v516_v36  ;;  %v728_v48 = vpop.f32.mrb[0].mxu1 }
 0x117   : > { %v690_v39 = vadd.f32 %v689_v38, %v520_v35  ;;  %v691_v40 = vpop.f32.mrb[2].mxu0  ;;  %v729_v49 = vadd.f32 %v728_v48, %v524_v47  ;;  %v2365_v50 = vpop.f32.mrb[1].mxu1 }
 0x118   : > { %v692_v41 = vpop.f32.mrb[3].mxu0  ;;  %v734_v45 = vpack.c.bf16 %v688_v42, %v688_v42  ;;  %v731_v51 = vpop.f32.mrb[2].mxu1 }
 0x119   : > { %v735_v43 = vpack.c.bf16 %v690_v39, %v690_v39  ;;  %v2870_v52 = vpack.c.bf16 %v729_v49, %v729_v49  ;;  %v2366_v53 = vpop.f32.mrb[3].mxu1 }
 0x11b   : > { %849 = vrot.lane.b32.xlu1 %v735_v43, %s2668_s17  ;;  %v742_v44 = vsel %vm737_vm1, %v735_v43, 0  ;;  %v803_v54 = vsel %vm801_vm2, %v2870_v52, 0 }
 0x11c   : > { %2368 = vmatpush3.bf16.xpose.msra.mxu1 %v742_v44 }
 0x11d   : > { %2373 = vmatprep.subr.bf16.mxu1 %v2666_v5 }
 0x11f   : > { %846 = vrot.lane.b32.xlu1 %v734_v45, %s2668_s17 }
 0x123   : > { %959 = vrot.lane.b32.xlu1 %v734_v45, %s2669_s18  ;;  %2370 = vmatmul.mubr.msk.bf16.vlgmr.msra.gmra.mrb[4].mxu1 %vm737_vm1, %v734_v45 }
 0x124   : > { %2375 = vmatprep.mubr.msk.bf16.mxu1 %vm2667_vm0, %v2666_v5  ;;  %2374 = vmatpush3.bf16.msra.mxu1 %v803_v54 }
 0x125   : > { %2379 = vmatprep.subr.bf16.mxu1 %v2666_v5 }
 0x127   : > { %1072 = vrot.lane.b32.xlu1 %v735_v43, %s2670_s9 }
 0x12b   : > { %1070 = vrot.lane.b32.xlu1 %v734_v45, %s2670_s9 }
 0x18d   : > { %v850_v2 = vpop.permute.xlu1 %849 }
 0x18e   : > { %v855_v15 = vsel %vm737_vm1, %v850_v2, 0 }
 0x191   : > { %v847_v3 = vpop.permute.xlu1 %846 }
 0x195   : > { %v960_v7 = vpop.permute.xlu1 %959 }
 0x199   : > { %v1073_v10 = vpop.permute.xlu1 %1072 }
 0x19a   : > { %v1078_v13 = vsel %vm737_vm1, %v1073_v10, 0 }
 0x19d   : > { %v1071_v16 = vpop.permute.xlu1 %1070 }
 0x1f6   : > { %v778_v55 = vpop.f32.mrb[4].mxu1 }
 0x1f7   : > { %v784_v56 = vmul.f32 0.17677669, %v778_v55  ;;  %v2371_v57 = vpop.f32.mrb[5].mxu1 }
 0x1f8   : > { %v781_v58 = vpop.f32.mrb[6].mxu1 }
 0x1f9   : > { %v2372_v59 = vpop.f32.mrb[7].mxu1  ;;  %v786_v60 = vsel %vm785_vm3, %v784_v56, -inf }
 0x1fa   : > { %787 = vmax.xlane.f32.xlu0 %v786_v60 }
 0x287   : > { %v788_v61 = vpop.xlane.xlu0 %787 }
 0x288   : > { %v789_v62 = vsub.f32 %v784_v56, %v788_v61 }
 0x28a   : > { %v790_v63 = vmul.f32 1.442695, %v789_v62 }
 0x28c   : > { %2564 = vpow2.f32 %v790_v63 }
 0x296   : > { %v2565_v0 = vpop.eup %2564 }
 0x297   : > { %v792_v1 = vsel %vm785_vm3, %v2565_v0, 0.0 }
 0x298   : > { %793 = vadd.xlane.f32.xlu0 %v792_v1 }
 0x2ae   : > { %961 = vrot.lane.b32.xlu0 %v735_v43, %s2669_s18 }
 0x325   : > { %v794_v6 = vpop.xlane.xlu0 %793 }
 0x326   : > { %2566 = vrcp.f32 %v794_v6 }
 0x329   : > { %v962_v8 = vpop.permute.xlu0 %961 }
 0x32a   : > { %v967_v9 = vsel %vm737_vm1, %v962_v8, 0 }
 0x32b   : > { %2392 = vmatpush3.bf16.xpose.msra.mxu0 %v967_v9 }
 0x32c   : > { %2403 = vmatprep.subr.bf16.mxu0 %v2666_v5 }
 0x330   : > { %v2567_v11 = vpop.eup %2566 }
 0x331   : > { %v796_v12 = vmul.f32 %v2567_v11, %v2565_v0 }
 0x332   : > { %2394 = vmatmul.mubr.msk.bf16.vlgmr.msra.gmra.mrb[4].mxu0 %vm737_vm1, %v960_v7 }
 0x333   : > { %2404 = vmatpush3.bf16.xpose.msra.mxu0 %v1078_v13  ;;  %v797_v14 = vpack.c.bf16 %v796_v12, %v796_v12  ;;  %2405 = vmatprep.mubr.msk.bf16.mxu0 %vm2667_vm0, %v2666_v5 }
 0x334   : > { %2415 = vmatprep.subr.bf16.mxu0 %v2666_v5 }
 0x335   : > { %2376 = vmatmul.mubr.msk.bf16.vlgmr.msra.gmra.mrb[8].mxu1 %vm785_vm3, %v797_v14 }
 0x336   : > { %2380 = vmatpush3.bf16.xpose.msra.mxu1 %v855_v15  ;;  %2381 = vmatprep.mubr.msk.bf16.mxu1 %vm2667_vm0, %v2666_v5  ;;  %v2516_v15 = vld [vmem:[%s2775_s14] sm:$0xff]  }
 0x337   : > { %2385 = vmatprep.subr.bf16.mxu1 %v2666_v5 }
 0x33a   : > { %2406 = vmatmul.mubr.msk.bf16.vlgmr.msra.gmra.mrb[8].mxu0 %vm737_vm1, %v1071_v16  ;;  %v2517_v16 = vld [vmem:[%s2775_s14 + $0x8] sm:$0xff]  }
 0x33b   : > { %2431 = vmatprep.mubr.msk.bf16.mxu0 %vm2667_vm0, %v2666_v5  ;;  %2416 = vmatpush3.bf16.msra.mxu0 %v2516_v15  ;;  %v2553_v15 = vld [vmem:[%s2785_s0 + $0x10] sm:$0xff]  }
 0x33c   : > { %2417 = vmatprep.subr.bf16.mxu0 %v2666_v5 }
 0x33d   : > { %2382 = vmatmul.mubr.msk.bf16.vlgmr.msra.gmra.mrb[12].mxu1 %vm737_vm1, %v847_v3 }
 0x33e   : > { %2387 = vmatprep.mubr.msk.bf16.mxu1 %vm2667_vm0, %v2666_v5 }
 0x33f   : > { %2418 = vmatpush3.bf16.msra.mxu0 %v2517_v16  ;;  %v2554_v16 = vld [vmem:[%s2785_s0 + $0x58] sm:$0xff]  }
 0x340   : > { %2419 = vmatprep.subr.bf16.mxu0 %v2666_v5 }
 0x405   : > { %v1003_v17 = vpop.f32.mrb[4].mxu0 }
 0x406   : > { %v1009_v18 = vmul.f32 0.17677669, %v1003_v17  ;;  %v2395_v19 = vpop.f32.mrb[5].mxu0  ;;  %v2518_v17 = vld [vmem:[%s2775_s14 + $0x10] sm:$0xff]  }
 0x407   : > { %v1006_v20 = vpop.f32.mrb[6].mxu0  ;;  %2420 = vmatpush3.bf16.msra.mxu0 %v2518_v17  ;;  %v2520_v19 = vld [vmem:[%s2775_s14 + $0x20] sm:$0xff]   ;;  %v2555_v17 = vld [vmem:[%s2785_s0 + $0x18] sm:$0xff]  }
 0x408   : > { %v2896_v21 = vpop.f32.mrb[8].mxu1  ;;  %v2396_v22 = vpop.f32.mrb[7].mxu0  ;;  %v1010_v23 = vsel %vm785_vm3, %v1009_v18, -inf  ;;  %2421 = vmatprep.subr.bf16.mxu0 %v2666_v5  ;;  %v2522_v20 = vld [vmem:[%s2775_s14 + $0x30] sm:$0xff]  }
 0x409   : > { %1011 = vmax.xlane.f32.xlu0 %v1010_v23  ;;  %v2377_v24 = vpop.f32.mrb[9].mxu1 }
 0x40a   : > { %v842_v26 = vpop.f32.mrb[10].mxu1 }
 0x40b   : > { %v2378_v27 = vpop.f32.mrb[11].mxu1 }
 0x40c   : > { %v2523_v27 = vld [vmem:[%s2775_s14 + $0x38] sm:$0xff]  }
 0x40d   : > { %v1114_v28 = vpop.f32.mrb[8].mxu0 }
 0x40e   : > { %v2407_v29 = vpop.f32.mrb[9].mxu0  ;;  %v1120_v40 = vmul.f32 0.17677669, %v1114_v28 }
 0x40f   : > { %v1117_v30 = vpop.f32.mrb[10].mxu0 }
 0x410   : > { %v891_v35 = vpop.f32.mrb[12].mxu1  ;;  %v2408_v36 = vpop.f32.mrb[11].mxu0  ;;  %v1121_v43 = vsel %vm785_vm3, %v1120_v40, -inf }
 0x411   : > { %v897_v37 = vmul.f32 0.17677669, %v891_v35  ;;  %v2383_v38 = vpop.f32.mrb[13].mxu1 }
 0x412   : > { %v894_v39 = vpop.f32.mrb[14].mxu1 }
 0x413   : > { %v2384_v41 = vpop.f32.mrb[15].mxu1  ;;  %v898_v42 = vsel %vm785_vm3, %v897_v37, -inf }
 0x414   : > { %899 = vmax.xlane.f32.xlu1 %v898_v42 }
 0x418   : > { %1122 = vmax.xlane.f32.xlu1 %v1121_v43 }
 0x496   : > { %v1012_v44 = vpop.xlane.xlu0 %1011 }
 0x497   : > { %v1013_v45 = vsub.f32 %v1009_v18, %v1012_v44  ;;  %v2519_v18 = vld [vmem:[%s2775_s14 + $0x18] sm:$0xff]  }
 0x498   : > { %2422 = vmatpush3.bf16.msra.mxu0 %v2519_v18  ;;  %v2556_v18 = vld [vmem:[%s2785_s0 + $0x60] sm:$0xff]  }
 0x499   : > { %v1014_v46 = vmul.f32 1.442695, %v1013_v45  ;;  %2423 = vmatprep.subr.bf16.mxu0 %v2666_v5 }
 0x49b   : > { %2568 = vpow2.f32 %v1014_v46  ;;  %v1217_v46 = vsub.s32 1, %v2843_v31 }
 0x49c   : > { %2424 = vmatpush3.bf16.msra.mxu0 %v2520_v19  ;;  %v2557_v19 = vld [vmem:[%s2785_s0 + $0x20] sm:$0xff]  }
 0x49d   : > { %2425 = vmatprep.subr.bf16.mxu0 %v2666_v5 }
 0x4a1   : > { %v900_v47 = vpop.xlane.xlu1 %899 }
 0x4a2   : > { %v901_v48 = vsub.f32 %v897_v37, %v900_v47  ;;  %v1218_v47 = vrot.slane %v2852_v34, %v1217_v46 }
 0x4a4   : > { %v902_v54 = vmul.f32 1.442695, %v901_v48 }
 0x4a5   : > { %v2569_v49 = vpop.eup %2568  ;;  %v1123_v50 = vpop.xlane.xlu1 %1122 }
 0x4a6   : > { %v1124_v51 = vsub.f32 %v1120_v40, %v1123_v50  ;;  %v1016_v53 = vsel %vm785_vm3, %v2569_v49, 0.0 }
 0x4a7   : > { %1017 = vadd.xlane.f32.xlu0 %v1016_v53 }
 0x4a8   : > { %v1125_v55 = vmul.f32 1.442695, %v1124_v51 }
 0x4aa   : > { %2570 = vpow2.f32 %v1125_v55  ;;  %v2526_v55 = vld [vmem:[%s2780_s16 + $0x4] ss:$8 sps:$4 sm:$0xff]  }
 0x4ab   : > { %2572 = vpow2.f32 %v902_v54  ;;  %v2524_v54 = vld [vmem:[%s2780_s16] ss:$8 sps:$4 sm:$0xff]  }
 0x4b4   : > { %v2571_v56 = vpop.eup %2570 }
 0x4b5   : > { %v1127_v57 = vsel %vm785_vm3, %v2571_v56, 0.0  ;;  %v2573_v58 = vpop.eup %2572 }
 0x4b6   : > { %1128 = vadd.xlane.f32.xlu1 %v1127_v57  ;;  %v904_v59 = vsel %vm785_vm3, %v2573_v58, 0.0  ;;  %v2527_v57 = vld [vmem:[%s2780_s16 + $0x10] ss:$8 sps:$4 sm:$0xff]  }
 0x4ba   : > { %905 = vadd.xlane.f32.xlu1 %v904_v59  ;;  %v2530_v59 = vld [vmem:[%s2780_s16 + $0x20] ss:$8 sps:$4 sm:$0xff]  }
 0x4bd   : > { %911 = vrot.lane.b32.xlu0 %v2870_v52, %s2668_s17 }
 0x4cb   : > { %1022 = vrot.lane.b32.xlu1 %v2870_v52, %s2669_s18 }
 0x4cf   : > { %1133 = vrot.lane.b32.xlu1 %v2870_v52, %s2670_s9 }
 0x534   : > { %v1018_v60 = vpop.xlane.xlu0 %1017 }
 0x538   : > { %v912_v61 = vpop.permute.xlu0 %911 }
 0x539   : > { %v917_v62 = vsel %vm801_vm2, %v912_v61, 0 }
 0x53a   : > { %2386 = vmatpush3.bf16.msra.mxu1 %v917_v62 }
 0x53b   : > { %2397 = vmatprep.subr.bf16.mxu1 %v2666_v5 }
 0x543   : > { %v1129_v63 = vpop.xlane.xlu1 %1128 }
 0x547   : > { %v906_v0 = vpop.xlane.xlu1 %905 }
 0x548   : > { %2574 = vrcp.f32 %v906_v0  ;;  %v2533_v0 = vld [vmem:[%s2780_s16 + $0x30] ss:$8 sps:$4 sm:$0xff]  }
 0x549   : > { %2576 = vrcp.f32 %v1018_v60 }
 0x54a   : > { %2578 = vrcp.f32 %v1129_v63  ;;  %v2535_v63 = vld [vmem:[%s2780_s16 + $0x34] ss:$8 sps:$4 sm:$0xff]  }
 0x54b   : > { %v1023_v3 = vpop.permute.xlu1 %1022 }
 0x54c   : > { %v1028_v8 = vsel %vm801_vm2, %v1023_v3, 0  ;;  %v2541_v3 = vld [vmem:[%s2780_s16 + $0x54] ss:$8 sps:$4 sm:$0xff]  }
 0x54f   : > { %v1134_v9 = vpop.permute.xlu1 %1133 }
 0x550   : > { %v1139_v12 = vsel %vm801_vm2, %v1134_v9, 0  ;;  %v2545_v9 = vld [vmem:[%s2780_s16 + $0x70] ss:$8 sps:$4 sm:$0xff]  }
 0x552   : > { %v2575_v1 = vpop.eup %2574 }
 0x553   : > { %v908_v2 = vmul.f32 %v2575_v1, %v2573_v58  ;;  %v2577_v7 = vpop.eup %2576  ;;  %v2532_v58 = vld [vmem:[%s2780_s16 + $0x24] ss:$8 sps:$4 sm:$0xff]  }
 0x554   : > { %v1020_v52 = vmul.f32 %v2577_v7, %v2569_v49  ;;  %v2579_v11 = vpop.eup %2578  ;;  %v2538_v1 = vld [vmem:[%s2780_s16 + $0x44] ss:$8 sps:$4 sm:$0xff]  }
 0x555   : > { %v909_v6 = vpack.c.bf16 %v908_v2, %v908_v2  ;;  %v1131_v13 = vmul.f32 %v2579_v11, %v2571_v56  ;;  %v2529_v56 = vld [vmem:[%s2780_s16 + $0x14] ss:$8 sps:$4 sm:$0xff]   ;;  %v2536_v2 = vld [vmem:[%s2780_s16 + $0x40] ss:$8 sps:$4 sm:$0xff]   ;;  %v2544_v7 = vld [vmem:[%s2780_s16 + $0x64] ss:$8 sps:$4 sm:$0xff]  }
 0x556   : > { %v1021_v10 = vpack.c.bf16 %v1020_v52, %v1020_v52  ;;  %v2547_v52 = vld [vmem:[%s2780_s16 + $0x74] ss:$8 sps:$4 sm:$0xff]   ;;  %v2549_v11 = vld [vmem:[%s2785_s0] sm:$0xff]  }
 0x557   : > { %2388 = vmatmul.mubr.msk.bf16.vlgmr.msra.gmra.mrb[16].mxu1 %vm785_vm3, %v909_v6  ;;  %v1132_v14 = vpack.c.bf16 %v1131_v13, %v1131_v13  ;;  %v2539_v6 = vld [vmem:[%s2780_s16 + $0x50] ss:$8 sps:$4 sm:$0xff]   ;;  %v2551_v13 = vld [vmem:[%s2785_s0 + $0x8] sm:$0xff]  }
 0x558   : > { %2398 = vmatpush3.bf16.msra.mxu1 %v1028_v8  ;;  %2399 = vmatprep.mubr.msk.bf16.mxu1 %vm2667_vm0, %v2666_v5  ;;  %v2542_v8 = vld [vmem:[%s2780_s16 + $0x60] ss:$8 sps:$4 sm:$0xff]  }
 0x559   : > { %2409 = vmatprep.subr.bf16.mxu1 %v2666_v5 }
 0x55f   : > { %2400 = vmatmul.mubr.msk.bf16.vlgmr.msra.gmra.mrb[20].mxu1 %vm785_vm3, %v1021_v10  ;;  %v2548_v10 = vld [vmem:[%s2785_s0 + $0x40] sm:$0xff]  }
 0x560   : > { %2410 = vmatpush3.bf16.msra.mxu1 %v1139_v12  ;;  %2411 = vmatprep.mubr.msk.bf16.mxu1 %vm2667_vm0, %v2666_v5  ;;  %v2550_v12 = vld [vmem:[%s2785_s0 + $0x48] sm:$0xff]  }
 0x561   : > { %1435 = vmatprep.subr.bf16.mxu1 %v2526_v55 }
 0x567   : > { %2412 = vmatmul.mubr.msk.bf16.vlgmr.msra.gmra.mrb[24].mxu1 %vm785_vm3, %v1132_v14  ;;  %v2552_v14 = vld [vmem:[%s2785_s0 + $0x50] sm:$0xff]  }
 0x568   : > { %1467 = vmatprep.mubr.bf16.mxu1 %v2665_v4  ;;  %v2521_v4 = vld [vmem:[%s2775_s14 + $0x28] sm:$0xff]   ;;  %1436 = vmatpush1.bf16.msra.mxu1 %v2524_v54 }
 0x569   : > { %2426 = vmatpush3.bf16.msra.mxu0 %v2521_v4  ;;  %1437 = vmatprep.subr.bf16.mxu1 %v2529_v56  ;;  %v2558_v4 = vld [vmem:[%s2785_s0 + $0x68] sm:$0xff]   ;;  %v1514_v56 = vsub.s32 5, %v2843_v31 }
 0x56a   : > { %2427 = vmatprep.subr.bf16.mxu0 %v2666_v5 }
 0x56c   : > { %1438 = vmatpush1.bf16.msra.mxu1 %v2527_v57 }
 0x56d   : > { %2428 = vmatpush3.bf16.msra.mxu0 %v2522_v20  ;;  %1439 = vmatprep.subr.bf16.mxu1 %v2532_v58  ;;  %v2559_v20 = vld [vmem:[%s2785_s0 + $0x28] sm:$0xff]   ;;  %v1515_v58 = vrot.slane %v2852_v34, %v1514_v56 }
 0x56e   : > { %2429 = vmatprep.subr.bf16.mxu0 %v2666_v5 }
 0x570   : > { %1440 = vmatpush1.bf16.msra.mxu1 %v2530_v59 }
 0x571   : > { %2430 = vmatpush3.bf16.msra.mxu0 %v2523_v27  ;;  %1441 = vmatprep.subr.bf16.mxu1 %v2535_v63  ;;  %v1327_v27 = vsub.s32 3, %v2843_v31 }
 0x572   : > { %2303 = vmatprep.subr.bf16.mxu0 %v2548_v10 }
 0x574   : > { %1442 = vmatpush1.bf16.msra.mxu1 %v2533_v0 }
 0x575   : > { %1443 = vmatprep.subr.bf16.mxu1 %v2538_v1 }
 0x578   : > { %1444 = vmatpush1.bf16.msra.mxu1 %v2536_v2 }
 0x579   : > { %1445 = vmatprep.subr.bf16.mxu1 %v2541_v3 }
 0x57c   : > { %1446 = vmatpush1.bf16.msra.mxu1 %v2539_v6 }
 0x57d   : > { %1447 = vmatprep.subr.bf16.mxu1 %v2544_v7 }
 0x580   : > { %1448 = vmatpush1.bf16.msra.mxu1 %v2542_v8  ;;  %v1666_v8 = vsub.s32 6, %v2843_v31 }
 0x581   : > { %1449 = vmatprep.subr.bf16.mxu1 %v2547_v52  ;;  %v1671_v52 = vsub.s32 7, %v2843_v31 }
 0x584   : > { %1450 = vmatpush1.bf16.msra.mxu1 %v2545_v9  ;;  %v1667_v9 = vrot.slane %v2852_v34, %v1666_v8 }
 0x62a   : > { %v953_v22 = vpop.f32.mrb[16].mxu1 }
 0x62b   : > { %1182 = vrot.lane.b32.xlu0 %v953_v22, %s2670_s9  ;;  %v2389_v23 = vpop.f32.mrb[17].mxu1 }
 0x62c   : > { %v956_v24 = vpop.f32.mrb[18].mxu1 }
 0x62d   : > { %v2390_v26 = vpop.f32.mrb[19].mxu1 }
 0x62e   : > { %v1322_v26 = vsub.s32 2, %v2843_v31 }
 0x632   : > { %v1064_v28 = vpop.f32.mrb[20].mxu1 }
 0x633   : > { %1186 = vrot.lane.b32.xlu1 %v1064_v28, %s2669_s18  ;;  %v2401_v29 = vpop.f32.mrb[21].mxu1  ;;  %v1323_v28 = vrot.slane %v2852_v34, %v1322_v26  ;;  %v2610_v26 = vld [vmem:[%s3120_s8] sm:$0xff] (!%p2230_p8)  }
 0x634   : > { %v1067_v30 = vpop.f32.mrb[22].mxu1 }
 0x635   : > { %v2402_v35 = vpop.f32.mrb[23].mxu1 }
 0x636   : > { %v1328_v35 = vrot.slane %v2852_v34, %v1327_v27  ;;  %v2599_v27 = vld [vmem:[%s3118_s6 + $0x40] ss:$8 sps:$4 sm:$0xff] (!%p2230_p8)  }
 0x63a   : > { %v1175_v36 = vpop.f32.mrb[24].mxu1 }
 0x63b   : > { %1190 = vrot.lane.b32.xlu0 %v1175_v36, %s2668_s17  ;;  %v2413_v37 = vpop.f32.mrb[25].mxu1 }
 0x63c   : > { %v1178_v38 = vpop.f32.mrb[26].mxu1 }
 0x63d   : > { %v2414_v39 = vpop.f32.mrb[27].mxu1 }
 0x63e   : > { %v2560_v39 = vld [vmem:[%s2785_s0 + $0x70] sm:$0xff]  }
 0x69d   : > { %v1183_v40 = vpop.permute.xlu0 %1182 }
 0x69e   : > { %v1193_v5 = vsel %vm737_vm1, %v2896_v21, %v1183_v40  ;;  %v2561_v40 = vld [vmem:[%s2785_s0 + $0x30] sm:$0xff]  }
 0x6a5   : > { %v1187_v41 = vpop.permute.xlu1 %1186 }
 0x6a6   : > { %v1195_v42 = vsel %vm1194_vm4, %v1193_v5, %v1187_v41  ;;  %v2562_v41 = vld [vmem:[%s2785_s0 + $0x78] sm:$0xff]  }
 0x6a7   : > { %v2563_v5 = vld [vmem:[%s2785_s0 + $0x38] sm:$0xff]  }
 0x6ad   : > { %v1191_v43 = vpop.permute.xlu0 %1190 }
 0x6ae   : > { %v1197_v44 = vsel %vm1196_vm5, %v1195_v42, %v1191_v43  ;;  %v1349_v42 = vsub.s32 4, %v2843_v31 }
 0x6af   : > { %v1198_v45 = vpack.c.bf16 %v1197_v44, %v1197_v44 }
 0x6b0   : > { %v1350_v43 = vrot.slane %v2852_v34, %v1349_v42  ;;  %v1354_v44 = vrot.slane %v2849_v33, %v1349_v42  ;;  %v2617_v42 = vld [vmem:[%s3120_s8 + $0x60] sm:$0xff] (!%p2230_p8)  }
 0x6b1   : > { %2432 = vmatmul.mubr.bf16.vlgmr.msra.gmra.mrb[12].mxu0 %v1198_v45 }
 0x6b2   : > { %2304 = vmatpush3.bf16.msra.mxu0 %v2549_v11  ;;  %v1672_v11 = vrot.slane %v2852_v34, %v1671_v52  ;;  %v2588_v34 = vld [vmem:[%s3118_s6 + $0x14] ss:$8 sps:$4 sm:$0xff] (!%p2230_p8)  }
 0x6b3   : > { %2305 = vmatprep.subr.bf16.mxu0 %v2550_v12 }
 0x6b6   : > { %2306 = vmatpush3.bf16.msra.mxu0 %v2551_v13 }
 0x6b7   : > { %2307 = vmatprep.subr.bf16.mxu0 %v2552_v14 }
 0x6ba   : > { %2308 = vmatpush3.bf16.msra.mxu0 %v2553_v15  ;;  %v2585_v15 = vld [vmem:[%s3118_s6 + $0x4] ss:$8 sps:$4 sm:$0xff] (!%p2230_p8)  }
 0x6bb   : > { %2309 = vmatprep.subr.bf16.mxu0 %v2554_v16  ;;  %v2587_v16 = vld [vmem:[%s3118_s6] ss:$8 sps:$4 sm:$0xff] (!%p2230_p8)  }
 0x6be   : > { %2310 = vmatpush3.bf16.msra.mxu0 %v2555_v17  ;;  %v2671_v17 = vmov (!%p2230_p8), 0  }
 0x6bf   : > { %2311 = vmatprep.subr.bf16.mxu0 %v2556_v18  ;;  %2584 = vset.pattern.permute.xlu0 (!%p2230_p8), %v2671_v17  ;;  %v2590_v18 = vld [vmem:[%s3118_s6 + $0x10] ss:$8 sps:$4 sm:$0xff] (!%p2230_p8)  }
 0x6c2   : > { %2312 = vmatpush3.bf16.msra.mxu0 %v2557_v19  ;;  %v2591_v19 = vld [vmem:[%s3118_s6 + $0x24] ss:$8 sps:$4 sm:$0xff] (!%p2230_p8)  }
 0x6c3   : > { %2313 = vmatprep.subr.bf16.mxu0 %v2558_v4  ;;  %v2593_v4 = vld [vmem:[%s3118_s6 + $0x20] ss:$8 sps:$4 sm:$0xff] (!%p2230_p8)  }
 0x6c6   : > { %2314 = vmatpush3.bf16.msra.mxu0 %v2559_v20  ;;  %v2594_v20 = vld [vmem:[%s3118_s6 + $0x34] ss:$8 sps:$4 sm:$0xff] (!%p2230_p8)  }
 0x6c7   : > { %2315 = vmatprep.subr.bf16.mxu0 %v2560_v39  ;;  %v2603_v39 = vld [vmem:[%s3118_s6 + $0x64] ss:$8 sps:$4 sm:$0xff] (!%p2230_p8)  }
 0x6ca   : > { %2316 = vmatpush3.bf16.msra.mxu0 %v2561_v40  ;;  %v2605_v40 = vld [vmem:[%s3118_s6 + $0x60] ss:$8 sps:$4 sm:$0xff] (!%p2230_p8)  }
 0x6cb   : > { %2317 = vmatprep.subr.bf16.mxu0 %v2562_v41  ;;  %v2606_v41 = vld [vmem:[%s3118_s6 + $0x74] ss:$8 sps:$4 sm:$0xff] (!%p2230_p8)  }
 0x6ce   : > { %2318 = vmatpush3.bf16.msra.mxu0 %v2563_v5  ;;  %v2616_v5 = vld [vmem:[%s3120_s8 + $0x18] sm:$0xff] (!%p2230_p8)  }
 0x6cf   : > { %1792 = vmatprep.subr.bf16.mxu0 (!%p2230_p8), %v2585_v15 }
 0x784   : > { %v1301_v48 = vpop.f32.mrb[12].mxu0 }
 0x785   : > { %v1302_v49 = vadd.f32 %v1301_v48, %v1218_v47  ;;  %v2433_v50 = vpop.f32.mrb[13].mxu0 }
 0x786   : > { %v1304_v21 = vpop.f32.mrb[14].mxu0 }
 0x787   : > { %v2434_v51 = vpop.f32.mrb[15].mxu0  ;;  %v1307_v53 = vadd.f32 %v1302_v49, %v2824_v25 }
 0x789   : > { %1308 = vadd.xlane.f32.xlu1 %v1307_v53 }
 0x816   : > { %v1309_v25 = vpop.xlane.xlu1 %1308 }
 0x817   : > { %v1311_v60 = vmul.f32 0.0078125, %v1309_v25 }
 0x819   : > { %v1312_v61 = vsub.f32 %v1307_v53, %v1311_v60 }
 0x81b   : > { %v1313_v62 = vmul.f32 %v1312_v61, %v1312_v61 }
 0x81d   : > { %1314 = vadd.xlane.f32.xlu0 %v1313_v62 }
 0x8aa   : > { %v1315_v22 = vpop.xlane.xlu0 %1314 }
 0x8ab   : > { %v1316_v23 = vmul.f32 0.0078125, %v1315_v22  ;;  %v2596_v22 = vld [vmem:[%s3118_s6 + $0x30] ss:$8 sps:$4 sm:$0xff] (!%p2230_p8)  }
 0x8ad   : > { %v1317_v24 = vadd.f32 1e-05, %v1316_v23  ;;  %v2597_v23 = vld [vmem:[%s3118_s6 + $0x44] ss:$8 sps:$4 sm:$0xff] (!%p2230_p8)  }
 0x8af   : > { %2580 = vrsqrt.f32 %v1317_v24  ;;  %v2609_v24 = vld [vmem:[%s3120_s8 + $0x40] sm:$0xff] (!%p2230_p8)  }
 0x8b0   : > { %2325 = vmatprep.subr.bf16.mxu1 (!%p2230_p8), %v2609_v24 }
 0x8b9   : > { %v2581_v29 = vpop.eup %2580 }
 0x8ba   : > { %v1319_v30 = vmul.f32 %v2581_v29, %v1312_v61  ;;  %v2612_v29 = vld [vmem:[%s3120_s8 + $0x8] sm:$0xff] (!%p2230_p8)  }
 0x8bc   : > { %v1324_v36 = vmul.f32 %v1323_v28, %v1319_v30  ;;  %v2611_v28 = vld [vmem:[%s3120_s8 + $0x48] sm:$0xff] (!%p2230_p8)   ;;  %v2613_v30 = vld [vmem:[%s3120_s8 + $0x50] sm:$0xff] (!%p2230_p8)  }
 0x8be   : > { %v1329_v37 = vadd.f32 %v1328_v35, %v1324_v36  ;;  %v2600_v35 = vld [vmem:[%s3118_s6 + $0x54] ss:$8 sps:$4 sm:$0xff] (!%p2230_p8)   ;;  %v2602_v36 = vld [vmem:[%s3118_s6 + $0x50] ss:$8 sps:$4 sm:$0xff] (!%p2230_p8)  }
 0x8c0   : > { %v1330_v38 = vpack.c.bf16 %v1329_v37, %v1329_v37 }
 0x8c2   : > { %1468 = vmatmul.mubr.bf16.vlgmr.msra.gmra.mrb[28].mxu1 %v1330_v38  ;;  %v2615_v38 = vld [vmem:[%s3120_s8 + $0x58] sm:$0xff] (!%p2230_p8)  }
 0x8c3   : > { %2326 = vmatpush3.bf16.msra.mxu1 (!%p2230_p8), %v2610_v26 }
 0x8c4   : > { %2327 = vmatprep.subr.bf16.mxu1 (!%p2230_p8), %v2611_v28 }
 0x8c7   : > { %2328 = vmatpush3.bf16.msra.mxu1 (!%p2230_p8), %v2612_v29 }
 0x8c8   : > { %2329 = vmatprep.subr.bf16.mxu1 (!%p2230_p8), %v2613_v30 }
 0x995   : > { %v1469_v45 = vpop.f32.mrb[28].mxu1 }
 0x996   : > { %v1470_v47 = vadd.f32 %v1469_v45, %v1350_v43  ;;  %v1471_v48 = vpop.f32.mrb[29].mxu1  ;;  %v2608_v45 = vld [vmem:[%s3118_s6 + $0x70] ss:$8 sps:$4 sm:$0xff] (!%p2230_p8)  }
 0x997   : > { %v1472_v49 = vadd.f32 %v1471_v48, %v1354_v44  ;;  %v1473_v50 = vpop.f32.mrb[30].mxu1  ;;  %v2618_v44 = vld [vmem:[%s3120_s8 + $0x20] sm:$0xff] (!%p2230_p8)  }
 0x998   : > { %v1476_v21 = vmax.f32 %v1470_v47, 0.0  ;;  %v1474_v51 = vpop.f32.mrb[31].mxu1  ;;  %v2619_v47 = vld [vmem:[%s3120_s8 + $0x68] sm:$0xff] (!%p2230_p8)   ;;  %v2621_v50 = vld [vmem:[%s3120_s8 + $0x70] sm:$0xff] (!%p2230_p8)  }
 0x999   : > { %v1477_v53 = vmax.f32 %v1472_v49, 0.0  ;;  %v2620_v49 = vld [vmem:[%s3120_s8 + $0x28] sm:$0xff] (!%p2230_p8)   ;;  %v2623_v51 = vld [vmem:[%s3120_s8 + $0x78] sm:$0xff] (!%p2230_p8)  }
 0x99a   : > { %v1478_v55 = vpack.c.bf16 %v1476_v21, %v1476_v21  ;;  %v2622_v21 = vld [vmem:[%s3120_s8 + $0x30] sm:$0xff] (!%p2230_p8)  }
 0x99b   : > { %v1479_v54 = vpack.c.bf16 %v1477_v53, %v1477_v53  ;;  %v2624_v53 = vld [vmem:[%s3120_s8 + $0x38] sm:$0xff] (!%p2230_p8)  }
 0x99d   : > { %1644 = vmatprep.mubr.bf16.mxu0 %v1479_v54  ;;  %v1700_v54 = vld [vmem:[%s3119_s7] sm:$0x3] (!%p2230_p8) }
 0x99e   : > { %1645 = vmatmul.mubr.bf16.vlgmr.msra.gmra.mrb[16].mxu0 %v1478_v55  ;;  %v1705_v55 = vrot.slane (!%p2230_p8), %v1700_v54, %v2846_v32  ;;  %v1709_v56 = vrot.slane (!%p2230_p8), %v1700_v54, %v1217_v46 }
 0x99f   : > { %1824 = vmatprep.mubr.bf16.mxu0 (!%p2230_p8), %v2671_v17  ;;  %1793 = vmatpush1.bf16.msra.mxu0 (!%p2230_p8), %v2587_v16 }
 0x9a0   : > { %1794 = vmatprep.subr.bf16.mxu0 (!%p2230_p8), %v2588_v34 }
 0x9a3   : > { %1795 = vmatpush1.bf16.msra.mxu0 (!%p2230_p8), %v2590_v18 }
 0x9a4   : > { %1796 = vmatprep.subr.bf16.mxu0 (!%p2230_p8), %v2591_v19 }
 0x9a7   : > { %1797 = vmatpush1.bf16.msra.mxu0 (!%p2230_p8), %v2593_v4 }
 0x9a8   : > { %1798 = vmatprep.subr.bf16.mxu0 (!%p2230_p8), %v2594_v20 }
 0x9ab   : > { %1799 = vmatpush1.bf16.msra.mxu0 (!%p2230_p8), %v2596_v22 }
 0x9ac   : > { %1800 = vmatprep.subr.bf16.mxu0 (!%p2230_p8), %v2597_v23 }
 0x9af   : > { %1801 = vmatpush1.bf16.msra.mxu0 (!%p2230_p8), %v2599_v27 }
 0x9b0   : > { %1802 = vmatprep.subr.bf16.mxu0 (!%p2230_p8), %v2600_v35 }
 0x9b3   : > { %1803 = vmatpush1.bf16.msra.mxu0 (!%p2230_p8), %v2602_v36 }
 0x9b4   : > { %1804 = vmatprep.subr.bf16.mxu0 (!%p2230_p8), %v2603_v39 }
 0x9b7   : > { %1805 = vmatpush1.bf16.msra.mxu0 (!%p2230_p8), %v2605_v40 }
 0x9b8   : > { %1806 = vmatprep.subr.bf16.mxu0 (!%p2230_p8), %v2606_v41 }
 0x9bb   : > { %1807 = vmatpush1.bf16.msra.mxu0 (!%p2230_p8), %v2608_v45 }
 0xa71   : > { %v2319_v57 = vpop.f32.mrb[16].mxu0 }
 0xa72   : > { %v2320_v59 = vpop.f32.mrb[17].mxu0 }
 0xa73   : > { %v2321_v25 = vadd.f32 %v2320_v59, %v2319_v57  ;;  %v2322_v33 = vpop.f32.mrb[18].mxu0 }
 0xa74   : > { %v2323_v60 = vpop.f32.mrb[19].mxu0 }
 0xa75   : > { %v1647_v61 = vadd.f32 %v2321_v25, %v1515_v58 }
 0xa77   : > { %v1652_v62 = vadd.f32 %v1647_v61, %v1329_v37  ;;  %v2614_v37 = vld [vmem:[%s3120_s8 + $0x10] sm:$0xff] (!%p2230_p8)  }
 0xa78   : > { %2330 = vmatpush3.bf16.msra.mxu1 (!%p2230_p8), %v2614_v37 }
 0xa79   : > { %1653 = vadd.xlane.f32.xlu0 %v1652_v62  ;;  %2331 = vmatprep.subr.bf16.mxu1 (!%p2230_p8), %v2615_v38 }
 0xa7c   : > { %2332 = vmatpush3.bf16.msra.mxu1 (!%p2230_p8), %v2616_v5 }
 0xa7d   : > { %2333 = vmatprep.subr.bf16.mxu1 (!%p2230_p8), %v2617_v42 }
 0xa80   : > { %2334 = vmatpush3.bf16.msra.mxu1 (!%p2230_p8), %v2618_v44 }
 0xa81   : > { %2335 = vmatprep.subr.bf16.mxu1 (!%p2230_p8), %v2619_v47 }
 0xa84   : > { %2336 = vmatpush3.bf16.msra.mxu1 (!%p2230_p8), %v2620_v49 }
 0xa85   : > { %2337 = vmatprep.subr.bf16.mxu1 (!%p2230_p8), %v2621_v50 }
 0xa88   : > { %2338 = vmatpush3.bf16.msra.mxu1 (!%p2230_p8), %v2622_v21 }
 0xa89   : > { %2339 = vmatprep.subr.bf16.mxu1 (!%p2230_p8), %v2623_v51 }
 0xa8c   : > { %2340 = vmatpush3.bf16.msra.mxu1 (!%p2230_p8), %v2624_v53 }
 0xb06   : > { %v1654_v63 = vpop.xlane.xlu0 %1653 }
 0xb07   : > { %v1655_v0 = vmul.f32 0.0078125, %v1654_v63 }
 0xb09   : > { %v1656_v1 = vsub.f32 %v1652_v62, %v1655_v0 }
 0xb0b   : > { %v1657_v2 = vmul.f32 %v1656_v1, %v1656_v1 }
 0xb0d   : > { %1658 = vadd.xlane.f32.xlu1 %v1657_v2 }
 0xb9a   : > { %v1659_v3 = vpop.xlane.xlu1 %1658 }
 0xb9b   : > { %v1660_v6 = vmul.f32 0.0078125, %v1659_v3  ;;  %v2247_v3 = vld [vmem:[#allocation3] ss:$0 sm:$0xff] (!%p2230_p8) }
 0xb9d   : > { %v1661_v7 = vadd.f32 1e-05, %v1660_v6 }
 0xb9f   : > { %2582 = vrsqrt.f32 %v1661_v7 }
 0xba9   : > { %v2583_v10 = vpop.eup %2582 }
 0xbaa   : > { %v1663_v12 = vmul.f32 %v2583_v10, %v1656_v1  ;;  %1678 = sbr.rel (%p2230_p8) target bundleno = 3562 (0xdea), region = 68 }
 0xbac   : > { %v1668_v13 = vmul.f32 %v1667_v9, %v1663_v12 }
 0xbae   : > { %v1673_v14 = vadd.f32 %v1672_v11, %v1668_v13 }
 0xbb0   : > { %1674 = vst [vmem:[#allocation2] sm:$0xff] %v1673_v14  ;;  %v1682_v43 = vrot.slane (!%p2230_p8), %v1673_v14, %v1671_v52 }
 0xbb2   : > { %v1683_v48 = vpack.c.bf16 %v1682_v43, %v1682_v43 }
 0xbb4   : > { %1825 = vmatmul.mubr.bf16.vlgmr.msra.gmra.mrb[0].mxu0 %v1683_v48 }
 0xc87   : > { %v1826_v57 = vpop.f32.mrb[0].mxu0 }
 0xc88   : > { %v1827_v58 = vadd.f32 %v1826_v57, %v1705_v55  ;;  %v1828_v59 = vpop.f32.mrb[1].mxu0 }
 0xc89   : > { %v1829_v25 = vadd.f32 %v1828_v59, %v1709_v56  ;;  %v1830_v33 = vpop.f32.mrb[2].mxu0 }
 0xc8a   : > { %v1833_v60 = vmax.f32 %v1827_v58, 0.0  ;;  %v1831_v61 = vpop.f32.mrb[3].mxu0 }
 0xc8b   : > { %v1834_v62 = vmax.f32 %v1829_v25, 0.0 }
 0xc8c   : > { %v1835_v0 = vpack.c.bf16 %v1833_v60, %v1833_v60 }
 0xc8d   : > { %v1836_v63 = vpack.c.bf16 %v1834_v62, %v1834_v62 }
 0xc8f   : > { %2004 = vmatprep.mubr.bf16.mxu1 %v1836_v63 }
 0xc90   : > { %2005 = vmatmul.mubr.bf16.vlgmr.msra.gmra.mrb[0].mxu1 %v1835_v0 }
 0xd63   : > { %v2341_v1 = vpop.f32.mrb[0].mxu1 }
 0xd64   : > { %v2342_v2 = vpop.f32.mrb[1].mxu1 }
 0xd65   : > { %v2343_v32 = vadd.f32 %v2342_v2, %v2341_v1  ;;  %v2344_v6 = vpop.f32.mrb[2].mxu1 }
 0xd66   : > { %v2345_v31 = vpop.f32.mrb[3].mxu1 }
 0xd67   : > { %v2007_v46 = vadd.f32 %v2343_v32, %v2247_v3 }
 0xd69   : > { %2014 = vperm.xlu0 %2584, %v2007_v46  }
 0xde8   : > { %v2015_v7 = vpop.permute.xlu0 %2014 }
 0xde9   : > { %2017 = vst [vmem:[%s2790_s26] sm:$0xff] %v2015_v7 }
 0xdea PF: > { %s22_s19 = sadd.s32 1, %s2663_s19   ;;  %s3131_s15 = sld [smem:[#allocation4_spill]] }
 0xdeb   : > { %p19_p9 = scmp.ge.s32.totalorder %s22_s19, 6   ;;  %s3132_s16 = sld [smem:[#allocation5_spill]] }
 0xdec   : > { %s3133_s17 = sld [smem:[#allocation6_spill]]  ;;  %s3134_s18 = sld [smem:[#allocation7_spill]] }
 0xded   :  { %21 = sbr.rel (!%p19_p9) target bundleno = 3 (0x3), region = 113 }

</bundles_post_ra>
